<compile_context>
chip_gen: v5e
topology: v5e:2x2
jax: 0.10.0
libtpu: 0.0.40
codegen_flags: <defaults>
</compile_context>

<pallas_src>
import functools

import jax
import jax.numpy as jnp
from jax.experimental import pallas as pl
from jax.experimental.pallas import tpu as pltpu

EPS = 1e-8
NEG_SLOPE = 0.2


def _downsample_kernel(xm_ref, xh_ref, w_ref, b_ref, o_ref, *,
                       th, wo, ci, compute_dtype, per_tap):
    # xm_ref: (1, 2*th, wo+1, 2*ci) f32  padded rows [2*th*h, 2*th*(h+1)); columns packed as
    #                                    (even-col channels | odd-col channels) along lanes
    # xh_ref: (1, 1,    wo+1, 2*ci) f32  padded row 2*th*(h+1)  (bottom halo row of the band)
    # w_ref : (9*ci, co_pad)             im2col weights, rows ordered (kh, kw, ci)
    # b_ref : (1, co_pad)           f32
    # o_ref : (1, th*wo, co_pad)    f32
    wo1 = wo + 1
    co_pad = o_ref.shape[-1]

    def act(v):
        # PixelNormal (L2 mean over the channel/lane dim) + LeakyReLU(0.2); f32 math,
        # rsqrt lowers to the EUP (separate bundle slot -> nearly free).
        inv = jax.lax.rsqrt(jnp.mean(v * v, axis=-1, keepdims=True) + EPS)
        v = v * inv
        return jnp.where(v > 0, v, NEG_SLOPE * v).astype(compute_dtype)

    xm = xm_ref[0]                                      # (2*th, wo1, 2*ci)
    xh = xh_ref[0]                                      # (1,    wo1, 2*ci)

    a_em, a_om = act(xm[..., :ci]), act(xm[..., ci:])   # even / odd columns, rows [0, 2*th)
    a_eh, a_oh = act(xh[..., :ci]), act(xh[..., ci:])   # even / odd columns, row 2*th

    def row_planes(a_main, a_halo):
        # Rows 2r, 2r+1, 2r+2 (r = 0..th-1) via a leading-dim split -- unit-stride ops only.
        pairs = a_main.reshape(th, 2, wo1, ci)
        r0 = pairs[:, 0]
        r1 = pairs[:, 1]
        r2 = a_halo if th == 1 else jnp.concatenate([pairs[1:, 0], a_halo], axis=0)
        return r0, r1, r2

    e_planes = row_planes(a_em, a_eh)                   # even input columns
    o_planes = row_planes(a_om, a_oh)                   # odd input columns

    # 9 taps: tap (kh, kw) reads padded pixel (2r + kh, 2c + kw); each tap is (th, wo, ci).
    taps = []
    for e_p, o_p in zip(e_planes, o_planes):            # kh = 0, 1, 2
        taps += [e_p[:, 0:wo], o_p[:, 0:wo], e_p[:, 1:wo1]]   # kw = 0, 1, 2

    if per_tap:
        # Lane-aligned Ci (Ci % 128 == 0): 9 MXU matmuls, K = Ci each, f32 accumulation.
        # Avoids materializing the (th*wo, 9*Ci) im2col block and the 9*Ci-wide lane concat.
        acc = None
        for t, tap in enumerate(taps):
            part = jnp.dot(tap.reshape(th * wo, ci),
                           w_ref[t * ci:(t + 1) * ci, :],       # static, sublane-aligned slice
                           preferred_element_type=jnp.float32)
            acc = part if acc is None else acc + part
        out = acc
    else:
        # Small / unaligned Ci: one lane concat, single MXU matmul with K = 9*Ci.
        patches = jnp.concatenate(taps, axis=-1).reshape(th * wo, 9 * ci)
        out = jnp.dot(patches, w_ref[...], preferred_element_type=jnp.float32)

    # Bias add on the VPU, lane-dense (co_pad % 128 == 0) unmasked store.
    o_ref[0] = (out + b_ref[...]).astype(o_ref.dtype)


def _choose_row_tile(n_batch, ho, wo, ci, co_pad):
    """Output rows per grid step: a divisor of `ho` whose per-step working set stays a few MB
    and (when possible) gives >= 4 grid steps (pipelining + both v7x TensorCores)."""
    wo1 = wo + 1
    budget = 4 << 20

    def step_bytes(d):
        in_main = 2 * (2 * d) * wo1 * (2 * ci) * 4      # double-buffered main input block (f32)
        acts = 2 * (2 * d + 1) * wo1 * ci * 4           # activated parity planes
        patch = d * wo * 9 * ci * 4                     # im2col / tap blocks (f32 upper bound)
        out_b = 2 * d * wo * co_pad * 4                 # double-buffered output block
        return in_main + acts + patch + out_b

    cands = [d for d in range(1, ho + 1)
             if ho % d == 0 and ((d * wo) % 8 == 0 or d == ho)]
    fitting = [d for d in cands if step_bytes(d) <= budget] or [min(cands)]
    th = max(fitting)
    smaller = sorted([d for d in fitting if d < th], reverse=True)
    while n_batch * (ho // th) < 4 and smaller:
        th = smaller.pop(0)
    return th


def downsample_forward(x, t, weight, bias, *, compute_dtype=jnp.bfloat16):
    """x: (N, C, H, W) f32 (NCHW, like PyTorch). weight: (Co, Ci, 3, 3); bias: (Co,).
    `t` is ignored, exactly as in the PyTorch module. Returns (N, Co, H//2, W//2)."""
    del t
    n, ci, hh, ww = x.shape
    co = weight.shape[0]
    assert hh % 2 == 0 and ww % 2 == 0, "spatial dims must be even"
    ho, wo = hh // 2, ww // 2
    wo1 = wo + 1

    # Lane-dense output: pad Co up to a multiple of 128 (a no-op at production channel counts).
    co_pad = max(128, ((co + 127) // 128) * 128)

    # The ONLY materialized input transform: NCHW -> padded NHWC (one fused HBM pass) ...
    xp = jnp.pad(jnp.transpose(x, (0, 2, 3, 1)), ((0, 0), (1, 1), (1, 1), (0, 0)))
    # ... followed by a free view packing (even col | odd col) channels on the lane dim.
    xp = xp.reshape(n, hh + 2, wo1, 2 * ci)

    # Weights -> im2col layout (kh, kw, ci) x co_pad; cast matmul operands to bf16 (default).
    w2 = jnp.transpose(weight, (2, 3, 1, 0)).reshape(9 * ci, co)
    w2 = jnp.pad(w2, ((0, 0), (0, co_pad - co))).astype(compute_dtype)
    b2 = jnp.pad(bias, (0, co_pad - co)).reshape(1, co_pad).astype(jnp.float32)

    th = _choose_row_tile(n, ho, wo, ci, co_pad)
    grid = (n, ho // th)
    per_tap = (ci % 128 == 0)   # lane-aligned channel count -> per-tap MXU accumulation path

    kernel = functools.partial(_downsample_kernel, th=th, wo=wo, ci=ci,
                               compute_dtype=compute_dtype, per_tap=per_tap)

    out = pl.pallas_call(
        kernel,
        out_shape=jax.ShapeDtypeStruct((n, ho * wo, co_pad), jnp.float32),
        grid_spec=pltpu.PrefetchScalarGridSpec(
            num_scalar_prefetch=0,
            grid=grid,
            in_specs=[
                # main band: 2*th padded rows per step (auto double-buffered)
                pl.BlockSpec((1, 2 * th, wo1, 2 * ci), lambda b, h: (b, h, 0, 0)),
                # 1-row halo at padded row 2*th*(h+1): second view over the same array
                pl.BlockSpec((1, 1, wo1, 2 * ci), lambda b, h: (b, 2 * th * (h + 1), 0, 0)),
                # constant weight / bias blocks (index_map constant across the grid ->
                # fetched once, kept resident by the pipeline)
                pl.BlockSpec((9 * ci, co_pad), lambda b, h: (0, 0)),
                pl.BlockSpec((1, co_pad), lambda b, h: (0, 0)),
            ],
            out_specs=pl.BlockSpec((1, th * wo, co_pad), lambda b, h: (b, h, 0)),
        ),
        compiler_params=pltpu.CompilerParams(
            dimension_semantics=("parallel", "parallel"),
            vmem_limit_bytes=32 * 1024 * 1024,
        ),
    )(xp, xp, w2, b2)

    # (N, Ho*Wo, Co_pad) -> NCHW (N, Co, Ho, Wo); only touches the 4x-smaller output.
    return jnp.transpose(out[:, :, :co].reshape(n, ho, wo, co), (0, 3, 1, 2))


def _ref_forward(x, weight, bias):
    # Pure-JAX reference matching the PyTorch module semantics (NCHW).
    l = jnp.sqrt(jnp.mean(x * x, axis=1, keepdims=True) + EPS)
    y = x / l
    y = jnp.where(y > 0, y, NEG_SLOPE * y)
    out = jax.lax.conv_general_dilated(
        y, weight, window_strides=(2, 2), padding=((1, 1), (1, 1)),
        dimension_numbers=("NCHW", "OIHW", "NCHW"),
        precision=jax.lax.Precision.HIGHEST)
    return out + bias[None, :, None, None]


def _make_params(key, ci, co):
    k1, k2 = jax.random.split(key)
    fan_in = ci * 3 * 3
    bound = 1.0 / (fan_in ** 0.5)
    weight = jax.random.uniform(k1, (co, ci, 3, 3), jnp.float32, -bound, bound)
    bias = jax.random.uniform(k2, (co,), jnp.float32, -bound, bound)
    return weight, bias


if __name__ == "__main__":
    key = jax.random.PRNGKey(0)
    kx, kt, kw, kx2, kw2 = jax.random.split(key, 5)

    fwd = jax.jit(downsample_forward, static_argnames=("compute_dtype",))

    # --- Case 1: small, unaligned channel count (im2col single-matmul path) ---
    N, C, H, W = 2, 4, 16, 16
    x = jax.random.normal(kx, (N, C, H, W), jnp.float32)
    t = jax.random.normal(kt, (N, 32), jnp.float32)  # ignored by the module's forward
    weight, bias = _make_params(kw, C, C)

    out_bf16 = jax.block_until_ready(fwd(x, t, weight, bias))                       # bf16 MXU operands
    out_f32 = jax.block_until_ready(fwd(x, t, weight, bias, compute_dtype=jnp.float32))
    assert out_bf16.shape == (N, C, H // 2, W // 2), out_bf16.shape

    ref = _ref_forward(x, weight, bias)
    if not jnp.allclose(out_f32, ref, rtol=1e-3, atol=1e-3):
        raise AssertionError(
            f"f32 kernel/reference mismatch, max abs err = {jnp.max(jnp.abs(out_f32 - ref))}")
    if not jnp.allclose(out_bf16, ref, rtol=2e-2, atol=2e-2):
        raise AssertionError(
            f"bf16 kernel/reference mismatch, max abs err = {jnp.max(jnp.abs(out_bf16 - ref))}")

    # --- Case 2: lane-aligned channel count (per-tap accumulation path, Ci = 128) ---
    N2, C2, H2, W2 = 1, 128, 8, 8
    x2 = jax.random.normal(kx2, (N2, C2, H2, W2), jnp.float32)
    weight2, bias2 = _make_params(kw2, C2, C2)

    out2 = jax.block_until_ready(fwd(x2, None, weight2, bias2, compute_dtype=jnp.float32))
    assert out2.shape == (N2, C2, H2 // 2, W2 // 2), out2.shape
    ref2 = _ref_forward(x2, weight2, bias2)
    if not jnp.allclose(out2, ref2, rtol=2e-2, atol=2e-2):
        raise AssertionError(
            f"per-tap kernel/reference mismatch, max abs err = {jnp.max(jnp.abs(out2 - ref2))}")

    print("KERNEL_OK")
</pallas_src>

<mosaic_0001>
module attributes {stable_mosaic.version = 11 : i64} {
  func.func @_downsample_kernel(%arg0: i32, %arg1: i32, %arg2: memref<1x8x9x8xf32, #tpu.memory_space<vmem>>, %arg3: memref<1x1x9x8xf32, #tpu.memory_space<vmem>>, %arg4: memref<36x128xbf16, #tpu.memory_space<vmem>>, %arg5: memref<1x128xf32, #tpu.memory_space<vmem>>, %arg6: memref<1x32x128xf32, #tpu.memory_space<vmem>>) attributes {dimension_semantics = [#tpu.dimension_semantics<parallel>, #tpu.dimension_semantics<parallel>], iteration_bounds = array<i64: 2, 2>, scalar_prefetch = 0 : i64, scratch_operands = 0 : i64, tpu.core_type = #tpu.core_type<tc>, window_params = [{transform_indices = @transform_0, window_bounds = array<i64: 1, 8, 9, 8>}, {transform_indices = @transform_1, window_bounds = array<i64: 1, 1, 9, 8>}, {pipeline_mode = #tpu.pipeline_mode<synchronous>, transform_indices = @transform_2, window_bounds = array<i64: 36, 128>}, {pipeline_mode = #tpu.pipeline_mode<synchronous>, transform_indices = @transform_3, window_bounds = array<i64: 1, 128>}, {transform_indices = @transform_4, window_bounds = array<i64: 1, 32, 128>}]} {
    %c0 = arith.constant 0 : index
    %c0_0 = arith.constant 0 : index
    %c0_1 = arith.constant 0 : index
    %c0_2 = arith.constant 0 : index
    %0 = vector.load %arg2[%c0, %c0_0, %c0_1, %c0_2] : memref<1x8x9x8xf32, #tpu.memory_space<vmem>>, vector<1x8x9x8xf32>
    %1 = vector.shape_cast %0 : vector<1x8x9x8xf32> to vector<8x9x8xf32>
    %c0_3 = arith.constant 0 : index
    %c0_4 = arith.constant 0 : index
    %c0_5 = arith.constant 0 : index
    %c0_6 = arith.constant 0 : index
    %2 = vector.load %arg3[%c0_3, %c0_4, %c0_5, %c0_6] : memref<1x1x9x8xf32, #tpu.memory_space<vmem>>, vector<1x1x9x8xf32>
    %3 = vector.shape_cast %2 : vector<1x1x9x8xf32> to vector<1x9x8xf32>
    %4 = vector.extract_strided_slice %1 {offsets = [0, 0, 0], sizes = [8, 9, 4], strides = [1, 1, 1]} : vector<8x9x8xf32> to vector<8x9x4xf32>
    %5 = arith.mulf %4, %4 : vector<8x9x4xf32>
    %cst = arith.constant dense<0.000000e+00> : vector<8x9xf32>
    %6 = vector.multi_reduction <add>, %5, %cst [2] : vector<8x9x4xf32> to vector<8x9xf32>
    %7 = vector.shape_cast %6 : vector<8x9xf32> to vector<8x9x1xf32>
    %cst_7 = arith.constant 4.000000e+00 : f32
    %8 = vector.broadcast %cst_7 : f32 to vector<8x9x1xf32>
    %9 = arith.divf %7, %8 : vector<8x9x1xf32>
    %cst_8 = arith.constant 9.99999993E-9 : f32
    %10 = vector.broadcast %cst_8 : f32 to vector<8x9x1xf32>
    %11 = arith.addf %9, %10 : vector<8x9x1xf32>
    %12 = math.rsqrt %11 : vector<8x9x1xf32>
    %13 = vector.broadcast %12 : vector<8x9x1xf32> to vector<8x9x4xf32>
    %14 = arith.mulf %4, %13 : vector<8x9x4xf32>
    %cst_9 = arith.constant 0.000000e+00 : f32
    %15 = vector.broadcast %cst_9 : f32 to vector<8x9x4xf32>
    %16 = arith.cmpf ogt, %14, %15 : vector<8x9x4xf32>
    %cst_10 = arith.constant 2.000000e-01 : f32
    %17 = vector.broadcast %cst_10 : f32 to vector<8x9x4xf32>
    %18 = arith.mulf %17, %14 : vector<8x9x4xf32>
    %19 = arith.select %16, %14, %18 : vector<8x9x4xi1>, vector<8x9x4xf32>
    %20 = arith.truncf %19 : vector<8x9x4xf32> to vector<8x9x4xbf16>
    %21 = vector.extract_strided_slice %1 {offsets = [0, 0, 4], sizes = [8, 9, 4], strides = [1, 1, 1]} : vector<8x9x8xf32> to vector<8x9x4xf32>
    %22 = arith.mulf %21, %21 : vector<8x9x4xf32>
    %cst_11 = arith.constant dense<0.000000e+00> : vector<8x9xf32>
    %23 = vector.multi_reduction <add>, %22, %cst_11 [2] : vector<8x9x4xf32> to vector<8x9xf32>
    %24 = vector.shape_cast %23 : vector<8x9xf32> to vector<8x9x1xf32>
    %cst_12 = arith.constant 4.000000e+00 : f32
    %25 = vector.broadcast %cst_12 : f32 to vector<8x9x1xf32>
    %26 = arith.divf %24, %25 : vector<8x9x1xf32>
    %cst_13 = arith.constant 9.99999993E-9 : f32
    %27 = vector.broadcast %cst_13 : f32 to vector<8x9x1xf32>
    %28 = arith.addf %26, %27 : vector<8x9x1xf32>
    %29 = math.rsqrt %28 : vector<8x9x1xf32>
    %30 = vector.broadcast %29 : vector<8x9x1xf32> to vector<8x9x4xf32>
    %31 = arith.mulf %21, %30 : vector<8x9x4xf32>
    %cst_14 = arith.constant 0.000000e+00 : f32
    %32 = vector.broadcast %cst_14 : f32 to vector<8x9x4xf32>
    %33 = arith.cmpf ogt, %31, %32 : vector<8x9x4xf32>
    %cst_15 = arith.constant 2.000000e-01 : f32
    %34 = vector.broadcast %cst_15 : f32 to vector<8x9x4xf32>
    %35 = arith.mulf %34, %31 : vector<8x9x4xf32>
    %36 = arith.select %33, %31, %35 : vector<8x9x4xi1>, vector<8x9x4xf32>
    %37 = arith.truncf %36 : vector<8x9x4xf32> to vector<8x9x4xbf16>
    %38 = vector.extract_strided_slice %3 {offsets = [0, 0, 0], sizes = [1, 9, 4], strides = [1, 1, 1]} : vector<1x9x8xf32> to vector<1x9x4xf32>
    %39 = arith.mulf %38, %38 : vector<1x9x4xf32>
    %cst_16 = arith.constant dense<0.000000e+00> : vector<1x9xf32>
    %40 = vector.multi_reduction <add>, %39, %cst_16 [2] : vector<1x9x4xf32> to vector<1x9xf32>
    %41 = vector.shape_cast %40 : vector<1x9xf32> to vector<1x9x1xf32>
    %cst_17 = arith.constant 4.000000e+00 : f32
    %42 = vector.broadcast %cst_17 : f32 to vector<1x9x1xf32>
    %43 = arith.divf %41, %42 : vector<1x9x1xf32>
    %cst_18 = arith.constant 9.99999993E-9 : f32
    %44 = vector.broadcast %cst_18 : f32 to vector<1x9x1xf32>
    %45 = arith.addf %43, %44 : vector<1x9x1xf32>
    %46 = math.rsqrt %45 : vector<1x9x1xf32>
    %47 = vector.broadcast %46 : vector<1x9x1xf32> to vector<1x9x4xf32>
    %48 = arith.mulf %38, %47 : vector<1x9x4xf32>
    %cst_19 = arith.constant 0.000000e+00 : f32
    %49 = vector.broadcast %cst_19 : f32 to vector<1x9x4xf32>
    %50 = arith.cmpf ogt, %48, %49 : vector<1x9x4xf32>
    %cst_20 = arith.constant 2.000000e-01 : f32
    %51 = vector.broadcast %cst_20 : f32 to vector<1x9x4xf32>
    %52 = arith.mulf %51, %48 : vector<1x9x4xf32>
    %53 = arith.select %50, %48, %52 : vector<1x9x4xi1>, vector<1x9x4xf32>
    %54 = arith.truncf %53 : vector<1x9x4xf32> to vector<1x9x4xbf16>
    %55 = vector.extract_strided_slice %3 {offsets = [0, 0, 4], sizes = [1, 9, 4], strides = [1, 1, 1]} : vector<1x9x8xf32> to vector<1x9x4xf32>
    %56 = arith.mulf %55, %55 : vector<1x9x4xf32>
    %cst_21 = arith.constant dense<0.000000e+00> : vector<1x9xf32>
    %57 = vector.multi_reduction <add>, %56, %cst_21 [2] : vector<1x9x4xf32> to vector<1x9xf32>
    %58 = vector.shape_cast %57 : vector<1x9xf32> to vector<1x9x1xf32>
    %cst_22 = arith.constant 4.000000e+00 : f32
    %59 = vector.broadcast %cst_22 : f32 to vector<1x9x1xf32>
    %60 = arith.divf %58, %59 : vector<1x9x1xf32>
    %cst_23 = arith.constant 9.99999993E-9 : f32
    %61 = vector.broadcast %cst_23 : f32 to vector<1x9x1xf32>
    %62 = arith.addf %60, %61 : vector<1x9x1xf32>
    %63 = math.rsqrt %62 : vector<1x9x1xf32>
    %64 = vector.broadcast %63 : vector<1x9x1xf32> to vector<1x9x4xf32>
    %65 = arith.mulf %55, %64 : vector<1x9x4xf32>
    %cst_24 = arith.constant 0.000000e+00 : f32
    %66 = vector.broadcast %cst_24 : f32 to vector<1x9x4xf32>
    %67 = arith.cmpf ogt, %65, %66 : vector<1x9x4xf32>
    %cst_25 = arith.constant 2.000000e-01 : f32
    %68 = vector.broadcast %cst_25 : f32 to vector<1x9x4xf32>
    %69 = arith.mulf %68, %65 : vector<1x9x4xf32>
    %70 = arith.select %67, %65, %69 : vector<1x9x4xi1>, vector<1x9x4xf32>
    %71 = arith.truncf %70 : vector<1x9x4xf32> to vector<1x9x4xbf16>
    %72 = vector.shape_cast %20 : vector<8x9x4xbf16> to vector<4x2x9x4xbf16>
    %73 = vector.extract_strided_slice %72 {offsets = [0, 0, 0, 0], sizes = [4, 1, 9, 4], strides = [1, 1, 1, 1]} : vector<4x2x9x4xbf16> to vector<4x1x9x4xbf16>
    %74 = vector.shape_cast %73 : vector<4x1x9x4xbf16> to vector<4x9x4xbf16>
    %75 = vector.extract_strided_slice %72 {offsets = [0, 1, 0, 0], sizes = [4, 1, 9, 4], strides = [1, 1, 1, 1]} : vector<4x2x9x4xbf16> to vector<4x1x9x4xbf16>
    %76 = vector.shape_cast %75 : vector<4x1x9x4xbf16> to vector<4x9x4xbf16>
    %77 = vector.extract_strided_slice %72 {offsets = [1, 0, 0, 0], sizes = [3, 1, 9, 4], strides = [1, 1, 1, 1]} : vector<4x2x9x4xbf16> to vector<3x1x9x4xbf16>
    %78 = vector.shape_cast %77 : vector<3x1x9x4xbf16> to vector<3x9x4xbf16>
    %79 = tpu.concatenate %78, %54 in 0 : vector<3x9x4xbf16>, vector<1x9x4xbf16> -> vector<4x9x4xbf16>
    %80 = vector.shape_cast %37 : vector<8x9x4xbf16> to vector<4x2x9x4xbf16>
    %81 = vector.extract_strided_slice %80 {offsets = [0, 0, 0, 0], sizes = [4, 1, 9, 4], strides = [1, 1, 1, 1]} : vector<4x2x9x4xbf16> to vector<4x1x9x4xbf16>
    %82 = vector.shape_cast %81 : vector<4x1x9x4xbf16> to vector<4x9x4xbf16>
    %83 = vector.extract_strided_slice %80 {offsets = [0, 1, 0, 0], sizes = [4, 1, 9, 4], strides = [1, 1, 1, 1]} : vector<4x2x9x4xbf16> to vector<4x1x9x4xbf16>
    %84 = vector.shape_cast %83 : vector<4x1x9x4xbf16> to vector<4x9x4xbf16>
    %85 = vector.extract_strided_slice %80 {offsets = [1, 0, 0, 0], sizes = [3, 1, 9, 4], strides = [1, 1, 1, 1]} : vector<4x2x9x4xbf16> to vector<3x1x9x4xbf16>
    %86 = vector.shape_cast %85 : vector<3x1x9x4xbf16> to vector<3x9x4xbf16>
    %87 = tpu.concatenate %86, %71 in 0 : vector<3x9x4xbf16>, vector<1x9x4xbf16> -> vector<4x9x4xbf16>
    %88 = vector.extract_strided_slice %74 {offsets = [0, 0, 0], sizes = [4, 8, 4], strides = [1, 1, 1]} : vector<4x9x4xbf16> to vector<4x8x4xbf16>
    %89 = vector.extract_strided_slice %82 {offsets = [0, 0, 0], sizes = [4, 8, 4], strides = [1, 1, 1]} : vector<4x9x4xbf16> to vector<4x8x4xbf16>
    %90 = vector.extract_strided_slice %74 {offsets = [0, 1, 0], sizes = [4, 8, 4], strides = [1, 1, 1]} : vector<4x9x4xbf16> to vector<4x8x4xbf16>
    %91 = vector.extract_strided_slice %76 {offsets = [0, 0, 0], sizes = [4, 8, 4], strides = [1, 1, 1]} : vector<4x9x4xbf16> to vector<4x8x4xbf16>
    %92 = vector.extract_strided_slice %84 {offsets = [0, 0, 0], sizes = [4, 8, 4], strides = [1, 1, 1]} : vector<4x9x4xbf16> to vector<4x8x4xbf16>
    %93 = vector.extract_strided_slice %76 {offsets = [0, 1, 0], sizes = [4, 8, 4], strides = [1, 1, 1]} : vector<4x9x4xbf16> to vector<4x8x4xbf16>
    %94 = vector.extract_strided_slice %79 {offsets = [0, 0, 0], sizes = [4, 8, 4], strides = [1, 1, 1]} : vector<4x9x4xbf16> to vector<4x8x4xbf16>
    %95 = vector.extract_strided_slice %87 {offsets = [0, 0, 0], sizes = [4, 8, 4], strides = [1, 1, 1]} : vector<4x9x4xbf16> to vector<4x8x4xbf16>
    %96 = vector.extract_strided_slice %79 {offsets = [0, 1, 0], sizes = [4, 8, 4], strides = [1, 1, 1]} : vector<4x9x4xbf16> to vector<4x8x4xbf16>
    %97 = tpu.concatenate %88, %89, %90, %91, %92, %93, %94, %95, %96 in 2 : vector<4x8x4xbf16>, vector<4x8x4xbf16>, vector<4x8x4xbf16>, vector<4x8x4xbf16>, vector<4x8x4xbf16>, vector<4x8x4xbf16>, vector<4x8x4xbf16>, vector<4x8x4xbf16>, vector<4x8x4xbf16> -> vector<4x8x36xbf16>
    %98 = vector.shape_cast %97 : vector<4x8x36xbf16> to vector<32x36xbf16>
    %c0_26 = arith.constant 0 : index
    %c0_27 = arith.constant 0 : index
    %99 = vector.load %arg4[%c0_26, %c0_27] : memref<36x128xbf16, #tpu.memory_space<vmem>>, vector<36x128xbf16>
    %cst_28 = arith.constant dense<0.000000e+00> : vector<32x128xf32>
    %100 = tpu.matmul %98, %99, %cst_28 {dimension_numbers = #tpu.dot_dimension_numbers<[1], [0], [0], [1], [0, 0, 1, 1], [], []>} : vector<32x36xbf16>, vector<36x128xbf16>, vector<32x128xf32> -> vector<32x128xf32>
    %c0_29 = arith.constant 0 : index
    %c0_30 = arith.constant 0 : index
    %101 = vector.load %arg5[%c0_29, %c0_30] : memref<1x128xf32, #tpu.memory_space<vmem>>, vector<1x128xf32>
    %102 = vector.broadcast %101 : vector<1x128xf32> to vector<32x128xf32>
    %103 = arith.addf %100, %102 : vector<32x128xf32>
    %c0_31 = arith.constant 0 : index
    %c0_32 = arith.constant 0 : index
    %c0_33 = arith.constant 0 : index
    %104 = vector.load %arg6[%c0_31, %c0_32, %c0_33] : memref<1x32x128xf32, #tpu.memory_space<vmem>>, vector<1x32x128xf32>
    %105 = vector.shape_cast %104 : vector<1x32x128xf32> to vector<32x128xf32>
    %106 = vector.shape_cast %103 : vector<32x128xf32> to vector<1x32x128xf32>
    tpu.vector_store %arg6[%c0_31, %c0_32, %c0_33], %106 {strides = array<i32>} : memref<1x32x128xf32, #tpu.memory_space<vmem>>, vector<1x32x128xf32>,
    return
  }
  func.func @transform_0(%arg0: i32, %arg1: i32) -> (i32, i32, i32, i32) {
    %c0_i32 = arith.constant 0 : i32
    %c0_i32_0 = arith.constant 0 : i32
    %c0_i32_1 = arith.constant 0 : i32
    return %arg0, %arg1, %c0_i32, %c0_i32_0 : i32, i32, i32, i32
  }
  func.func @transform_1(%arg0: i32, %arg1: i32) -> (i32, i32, i32, i32) {
    %c1_i32 = arith.constant 1 : i32
    %0 = arith.addi %arg1, %c1_i32 : i32
    %c8_i32 = arith.constant 8 : i32
    %1 = arith.muli %c8_i32, %0 : i32
    %c0_i32 = arith.constant 0 : i32
    %c0_i32_0 = arith.constant 0 : i32
    %c0_i32_1 = arith.constant 0 : i32
    return %arg0, %1, %c0_i32, %c0_i32_0 : i32, i32, i32, i32
  }
  func.func @transform_2(%arg0: i32, %arg1: i32) -> (i32, i32) {
    %c0_i32 = arith.constant 0 : i32
    %c0_i32_0 = arith.constant 0 : i32
    %c0_i32_1 = arith.constant 0 : i32
    return %c0_i32, %c0_i32_0 : i32, i32
  }
  func.func @transform_3(%arg0: i32, %arg1: i32) -> (i32, i32) {
    %c0_i32 = arith.constant 0 : i32
    %c0_i32_0 = arith.constant 0 : i32
    %c0_i32_1 = arith.constant 0 : i32
    return %c0_i32, %c0_i32_0 : i32, i32
  }
  func.func @transform_4(%arg0: i32, %arg1: i32) -> (i32, i32, i32) {
    %c0_i32 = arith.constant 0 : i32
    %c0_i32_0 = arith.constant 0 : i32
    return %arg0, %arg1, %c0_i32 : i32, i32, i32
  }
}

</mosaic_0001>

<bundles_post_ra>
// kernel: downsample_forward.1
= control target key start
LH: loop header
LB: loop body
LE: loop exit
PB: predicated region body
PF: predicated region fallthrough
CT: control target
= control target key end

     0   :  { %s1613_s15 = smov 0   ;;  %s1615_s16 = smov 0   ;;  %s2606_s0 = inlined_call_operand.vmem [shape: f32[2,18,9,8], index: 0, kind: input, shape index: {}, may-alias: {0,1}]   ;;  %s2607_s1 = inlined_call_operand.vmem [shape: f32[2,18,9,8], index: 1, kind: input, shape index: {}, may-alias: {0,1}]   ;;  %s2608_s2 = inlined_call_operand.vmem [shape: bf16[36,128], index: 2, kind: input, shape index: {}]   ;;  %s2609_s3 = inlined_call_operand.vmem [shape: f32[1,128], index: 3, kind: input, shape index: {}]   ;;  %s2610_s4 = inlined_call_operand.vmem [shape: f32[2,64,128], index: 4, kind: output, shape index: {}]  }
   0x1   :  { %s1617_s17 = smov 0   ;;  %s1619_s18 = smov 0  }
   0x2   :  { %s1621_s19 = smov 0  }
   0x3 LB: > { %s23_s20 = sadd.s32 1, %s1571_s17  ;;  %s26_s21 = sadd.s32 1, %s1575_s18  ;;  %s1579_s19 = sphi %s1621_s19, %s14_s19   ;;  %s1575_s18 = sphi %s1619_s18, %s2660_s18   ;;  %s1571_s17 = sphi %s1617_s17, %s2659_s17   ;;  %s1567_s16 = sphi %s1615_s16, %s2658_s16   ;;  %s1563_s15 = sphi %s1613_s15, %s2657_s15  }
   0x4   : > { %p24_p0 = scmp.ge.s32.totalorder %s23_s20, 2  ;;  %p1394_p1 = scmp.ge.s32.totalorder %s1579_s19, 1 }
   0x5   : > { %p218_p2 = scmp.lt.s32.totalorder %s1579_s19, 5 }
   0x6   : > { %s2662_s20 = smov (%p24_p0, %s23_s20), 0  ;;  %s2664_s21 = smov (!%p24_p0, %s26_s21), %s1575_s18 }
   0x7   : > { %p219_p3 = pnand %p1394_p1, %p218_p2  ;;  %p28_p4 = scmp.ge.s32.totalorder %s2664_s21, 2 }
   0x8   : > { %s1395_s22 = sshll.u32 (!%p219_p3), %s1563_s15, 3  ;;  %p275_p5 = scmp.lt.s32.totalorder (!%p219_p3), %s1567_s16, 1 }
   0x9   : > { %s2666_s21 = smov (%p28_p4, %s2664_s21), 0  ;;  %222 = sbr.rel (%p219_p3) target bundleno = 627 (0x273), region = 36 }
   0xa   : > { %p277_p6 = scmp.lt.s32.totalorder (!%p219_p3), %s1395_s22, 17  ;;  %s1421_s25 = sadd.s32 (!%p219_p3), 8, %s1395_s22 }
   0xb   : > { %p294_p7 = scmp.lt.s32.totalorder (!%p219_p3), %s1421_s25, 17  ;;  %s1581_s7 = smov (!%p219_p3), 124  }
   0xc   : > { %s1583_s13 = smov (!%p219_p3), 8   ;;  %s1584_s14 = smov (!%p219_p3), 12  }
   0xe   : > { %s2668_s16 = smov (!%p275_p5, %s1567_s16), 1  ;;  %s2670_s25 = smov (!%p294_p7, %s1421_s25), 17  ;;  %vm348_vm0 = vcmask 31744   ;;  %vm352_vm1 = vcmask 24576  }
   0xf   : > { %s278_s23 = scalar_select %p277_p6, %s1395_s22, 17 }
  0x10   : > { %s1427_s24 = smul.u32 36, %s2668_s16  ;;  %s1399_s6 = sshll.u32 %s2670_s25, 1 }
  0x11   : > { %s1396_s26 = sshll.u32 %s278_s23, 1  ;;  %s1585_s22 = smov 20  }
  0x12   : > { %s281_s27 = sadd.s32 %s1427_s24, %s1396_s26  ;;  %s298_s8 = sadd.s32 %s1427_s24, %s1399_s6 }
  0x13   : > { %s1397_s28 = sshll.u32 %s281_s27, 3  ;;  %s1400_s9 = sshll.u32 %s298_s8, 3 }
  0x14   : > { %s1652_s5 = scalar_lea.vmem %s2606_s0, %s1397_s28  ;;  %s1693_s12 = scalar_lea.vmem %s2607_s1, %s1400_s9 }
  0x15   : > { %v1655_v0 = vld [vmem:[%s1652_s5 + $0x50] sm:$0xff]  ;;  %v1658_v1 = vld [vmem:[%s1652_s5 + $0x20] sm:$0xff]  ;;  %v1717_v19 = vld [vmem:[%s1652_s5 + $0x28] sm:$0x1]  ;;  %s1586_s23 = smov 24   ;;  %s1587_s24 = smov 32  }
  0x16   : > { %v1661_v2 = vld [vmem:[%s1652_s5 + $0x10] sm:$0xff]  ;;  %v1665_v3 = vmul.f32 %v1655_v0, %v1655_v0  ;;  %v336_v4 = vmul.f32 %v1658_v1, %v1658_v1  ;;  %v1679_v7 = vld [vmem:[%s1652_s5 + $0x40] sm:$0xff]  ;;  %v1720_v20 = vld [vmem:[%s1652_s5 + $0x8] sm:$0x1]  ;;  %v337_v21 = vmul.f32 %v1717_v19, %v1717_v19  ;;  %s1402_s6 = sshll.u32 %s2668_s16, 3 }
  0x17   : > { %v334_v5 = vmul.f32 %v1661_v2, %v1661_v2  ;;  %v1676_v6 = vld [vmem:[%s1652_s5 + $0x70] sm:$0xff]  ;;  %v340_v10 = vmul.f32 %v1679_v7, %v1679_v7  ;;  %v1699_v12 = vld [vmem:[%s1693_s12] sm:$0xff]  ;;  %v333_v22 = vmul.f32 %v1720_v20, %v1720_v20  ;;  %v1730_v26 = vld [vmem:[%s1652_s5 + $0x48] sm:$0x1] }
  0x18   : > { %695 = vrot.lane.b32.xlu1 %v1665_v3, %s1581_s7  ;;  %689 = vrot.lane.b32.xlu2 %v336_v4, %s1581_s7  ;;  %v1682_v8 = vld [vmem:[%s1652_s5 + $0x30] sm:$0xff]  ;;  %v346_v9 = vmul.f32 %v1676_v6, %v1676_v6  ;;  %v1702_v13 = vld [vmem:[%s1652_s5 + $0x60] sm:$0xff]  ;;  %v869_v14 = vmul.f32 %v1699_v12, %v1699_v12  ;;  %v365_v23 = vsel %vm352_vm1, %v337_v21, 0.0  ;;  %v362_v24 = vsel %vm348_vm0, %v336_v4, 0.0 }
  0x19   : > { %687 = vrot.lane.b32.xlu0 %v334_v5, %s1581_s7  ;;  %v338_v11 = vmul.f32 %v1682_v8, %v1682_v8  ;;  %v344_v15 = vmul.f32 %v1702_v13, %v1702_v13  ;;  %v1711_v16 = vld [vmem:[%s1652_s5] sm:$0xff]  ;;  %v353_v25 = vsel %vm352_vm1, %v333_v22, 0.0  ;;  %v341_v27 = vmul.f32 %v1730_v26, %v1730_v26  ;;  %v1737_v30 = vld [vmem:[%s1652_s5 + $0x68] sm:$0x1]  ;;  %v1741_v32 = vld [vmem:[%s1652_s5 + $0x18] sm:$0x1] }
  0x1a   : > { %v332_v17 = vmul.f32 %v1711_v16, %v1711_v16  ;;  %v374_v28 = vsel %vm348_vm0, %v340_v10, 0.0  ;;  %v345_v33 = vmul.f32 %v1737_v30, %v1737_v30  ;;  %v335_v34 = vmul.f32 %v1741_v32, %v1741_v32  ;;  %v1751_v38 = vld [vmem:[%s1652_s5 + $0x38] sm:$0x1]  ;;  %v1773_v50 = vld [vmem:[%s1693_s12 + $0x8] sm:$0x1] }
  0x1b   : > { %v386_v29 = vsel %vm348_vm0, %v344_v15, 0.0  ;;  %v377_v31 = vsel %vm352_vm1, %v341_v27, 0.0  ;;  %v356_v37 = vsel %vm348_vm0, %v334_v5, 0.0  ;;  %v339_v39 = vmul.f32 %v1751_v38, %v1751_v38  ;;  %v1759_v42 = vld [vmem:[%s1652_s5 + $0x58] sm:$0x1] }
  0x1c   : > { %v349_v18 = vsel %vm348_vm0, %v332_v17, 0.0  ;;  %v389_v35 = vsel %vm352_vm1, %v345_v33, 0.0  ;;  %v359_v36 = vsel %vm352_vm1, %v335_v34, 0.0  ;;  %v368_v40 = vsel %vm348_vm0, %v338_v11, 0.0  ;;  %v1763_v44 = vld [vmem:[%s1652_s5 + $0x78] sm:$0x1] }
  0x1d   : > { %v380_v41 = vsel %vm348_vm0, %v1665_v3, 0.0  ;;  %v371_v43 = vsel %vm352_vm1, %v339_v39, 0.0  ;;  %v343_v45 = vmul.f32 %v1759_v42, %v1759_v42  ;;  %v347_v46 = vmul.f32 %v1763_v44, %v1763_v44 }
  0x1e   : > { %v392_v49 = vsel %vm348_vm0, %v346_v9, 0.0  ;;  %v870_v51 = vmul.f32 %v1773_v50, %v1773_v50  ;;  %v871_v52 = vsel %vm348_vm0, %v869_v14, 0.0  ;;  %v1582_v5 = vmov 4.0  }
  0x1f   : > { %v383_v47 = vsel %vm352_vm1, %v343_v45, 0.0  ;;  %v395_v48 = vsel %vm352_vm1, %v347_v46, 0.0  ;;  %1476 = vrcp.f32 %v1582_v5 }
  0x20   : > { %699 = vrot.lane.b32.xlu1 %v346_v9, %s1581_s7  ;;  %693 = vrot.lane.b32.xlu2 %v340_v10, %s1581_s7  ;;  %v874_v53 = vsel %vm352_vm1, %v870_v51, 0.0 }
  0x21   : > { %691 = vrot.lane.b32.xlu0 %v338_v11, %s1581_s7 }
  0x25   : > { %v1477_v11 = vpop.eup %1476 }
  0x26   : > { %vm403_vm2 = vweird.f32 %v1477_v11 }
  0x28   : > { %912 = vrot.lane.b32.xlu1 %v869_v14, %s1581_s7  ;;  %v399_v14 = vmul.f32 4.0, %v1477_v11 }
  0x29   : > { %697 = vrot.lane.b32.xlu0 %v344_v15, %s1581_s7 }
  0x2a   : > { %v400_v15 = vsub.f32 1.0, %v399_v14 }
  0x2c   : > { %v401_v21 = vmul.f32 %v1477_v11, %v400_v15 }
  0x2e   : > { %v402_v22 = vadd.f32 %v1477_v11, %v401_v21 }
  0x49   : > { %350 = vadd.xlane.f32.xlu2 %v349_v18 }
  0x51   : > { %366 = vadd.xlane.f32.xlu2 %v365_v23  ;;  %v1788_v23 = vsel %vm403_vm2, %v1477_v11, %v402_v22 }
  0x52   : > { %363 = vadd.xlane.f32.xlu1 %v362_v24 }
  0x53   : > { %354 = vadd.xlane.f32.xlu0 %v353_v25 }
  0x59   : > { %375 = vadd.xlane.f32.xlu2 %v374_v28 }
  0x5a   : > { %387 = vadd.xlane.f32.xlu1 %v386_v29 }
  0x5b   : > { %378 = vadd.xlane.f32.xlu0 %v377_v31 }
  0x61   : > { %390 = vadd.xlane.f32.xlu2 %v389_v35 }
  0x62   : > { %360 = vadd.xlane.f32.xlu1 %v359_v36 }
  0x63   : > { %357 = vadd.xlane.f32.xlu0 %v356_v37 }
  0x69   : > { %369 = vadd.xlane.f32.xlu2 %v368_v40 }
  0x6a   : > { %381 = vadd.xlane.f32.xlu1 %v380_v41 }
  0x6b   : > { %372 = vadd.xlane.f32.xlu0 %v371_v43 }
  0x71   : > { %384 = vadd.xlane.f32.xlu2 %v383_v47 }
  0x72   : > { %396 = vadd.xlane.f32.xlu1 %v395_v48  ;;  %v690_v60 = vpop.permute.xlu2 %689 }
  0x73   : > { %393 = vadd.xlane.f32.xlu0 %v392_v49  ;;  %v715_v63 = vsel %vm348_vm0, %v690_v60, 0.0 }
  0x79   : > { %872 = vadd.xlane.f32.xlu2 %v871_v52 }
  0x7a   : > { %v694_v3 = vpop.permute.xlu2 %693 }
  0x7b   : > { %875 = vadd.xlane.f32.xlu0 %v874_v53  ;;  %v721_v9 = vsel %vm348_vm0, %v694_v3, 0.0 }
  0x8a   : > { %v696_v56 = vpop.permute.xlu1 %695 }
  0x8b   : > { %v688_v54 = vpop.permute.xlu0 %687  ;;  %685 = vrot.lane.b32.xlu1 %v332_v17, %s1581_s7  ;;  %v724_v59 = vsel %vm348_vm0, %v696_v56, 0.0 }
  0x8c   : > { %v712_v55 = vsel %vm348_vm0, %v688_v54, 0.0 }
  0x8d   : > { %713 = vadd.xlane.f32.xlu2 %v712_v55 }
  0x92   : > { %v700_v61 = vpop.permute.xlu1 %699 }
  0x93   : > { %v692_v57 = vpop.permute.xlu0 %691  ;;  %v730_v62 = vsel %vm348_vm0, %v700_v61, 0.0 }
  0x94   : > { %v718_v58 = vsel %vm348_vm0, %v692_v57, 0.0 }
  0x95   : > { %719 = vadd.xlane.f32.xlu0 %v718_v58  ;;  %725 = vadd.xlane.f32.xlu2 %v724_v59 }
  0x9a   : > { %v913_v4 = vpop.permute.xlu1 %912 }
  0x9b   : > { %v915_v10 = vsel %vm348_vm0, %v913_v4, 0.0  ;;  %v698_v17 = vpop.permute.xlu0 %697 }
  0x9c   : > { %v727_v18 = vsel %vm348_vm0, %v698_v17, 0.0 }
  0x9d   : > { %731 = vadd.xlane.f32.xlu0 %v730_v62  ;;  %716 = vadd.xlane.f32.xlu2 %v715_v63 }
  0xa5   : > { %722 = vadd.xlane.f32.xlu0 %v721_v9  ;;  %916 = vadd.xlane.f32.xlu2 %v915_v10 }
  0xb5   : > { %728 = vadd.xlane.f32.xlu1 %v727_v18 }
  0xbc   : > { %v351_v24 = vpop.xlane.xlu2 %350 }
  0xbd   : > { %v405_v25 = vmul.f32 %v1788_v23, %v351_v24 }
  0xbf   : > { %v421_v27 = vadd.f32 1e-08, %v405_v25 }
  0xc1   : > { %1478 = vrsqrt.f32 %v421_v27  ;;  %vm443_vm3 = vweird.f32 %v421_v27 }
  0xc4   : > { %v367_v28 = vpop.xlane.xlu2 %366 }
  0xc5   : > { %v410_v29 = vmul.f32 %v1788_v23, %v367_v28  ;;  %v364_v31 = vpop.xlane.xlu1 %363 }
  0xc6   : > { %v409_v33 = vmul.f32 %v1788_v23, %v364_v31  ;;  %v355_v34 = vpop.xlane.xlu0 %354 }
  0xc7   : > { %v1793_v35 = vpop.eup %1478  ;;  %v1795_v36 = vadd.f32 1e-08, %v410_v29  ;;  %v406_v37 = vmul.f32 %v1788_v23, %v355_v34 }
  0xc8   : > { %v438_v39 = vmul.f32 %v1793_v35, %v421_v27  ;;  %v1802_v41 = vadd.f32 1e-08, %v409_v33  ;;  %vm444_vm4 = vweird.f32 %v1793_v35 }
  0xc9   : > { %1480 = vrsqrt.f32 %v1795_v36  ;;  %v1800_v40 = vadd.f32 1e-08, %v406_v37  ;;  %vm1846_vm5 = vmor %vm443_vm3, %vm444_vm4  ;;  %vm493_vm6 = vweird.f32 %v1795_v36 }
  0xca   : > { %v439_v45 = vmul.f32 %v1793_v35, %v438_v39 }
  0xcb   : > { %1482 = vrsqrt.f32 %v1800_v40  ;;  %vm453_vm8 = vweird.f32 %v1800_v40 }
  0xcc   : > { %v376_v43 = vpop.xlane.xlu2 %375  ;;  %1484 = vrsqrt.f32 %v1802_v41  ;;  %v440_v57 = vmul.f32 0.5, %v439_v45 }
  0xcd   : > { %v413_v46 = vmul.f32 %v1788_v23, %v376_v43  ;;  %v388_v47 = vpop.xlane.xlu1 %387 }
  0xce   : > { %v417_v48 = vmul.f32 %v1788_v23, %v388_v47  ;;  %v379_v49 = vpop.xlane.xlu0 %378  ;;  %v441_v63 = vsub.f32 1.5, %v440_v57 }
  0xcf   : > { %v1809_v51 = vpop.eup %1480  ;;  %v1811_v52 = vadd.f32 1e-08, %v413_v46  ;;  %v414_v55 = vmul.f32 %v1788_v23, %v379_v49 }
  0xd0   : > { %v488_v53 = vmul.f32 %v1809_v51, %v1795_v36  ;;  %v1815_v54 = vadd.f32 1e-08, %v417_v48  ;;  %v442_v21 = vmul.f32 %v1793_v35, %v441_v63  ;;  %vm494_vm7 = vweird.f32 %v1809_v51 }
  0xd1   : > { %v1818_v56 = vpop.eup %1482  ;;  %1486 = vrsqrt.f32 %v1811_v52  ;;  %v1827_v61 = vadd.f32 1e-08, %v414_v55  ;;  %vm1881_vm10 = vmor %vm493_vm6, %vm494_vm7  ;;  %vm523_vm14 = vweird.f32 %v1811_v52 }
  0xd2   : > { %v448_v58 = vmul.f32 %v1818_v56, %v1800_v40  ;;  %1488 = vrsqrt.f32 %v1815_v54  ;;  %v1824_v59 = vpop.eup %1484  ;;  %v489_v60 = vmul.f32 %v1809_v51, %v488_v53  ;;  %v446_v34 = vsel %vm1846_vm5, %v1793_v35, %v442_v21 }
  0xd3   : > { %v478_v9 = vmul.f32 %v1824_v59, %v1802_v41  ;;  %1490 = vrsqrt.f32 %v1827_v61  ;;  %vm454_vm9 = vweird.f32 %v1818_v56  ;;  %v1873_v53 = vmul.f32 %v446_v34, %v1711_v16 }
  0xd4   : > { %v391_v62 = vpop.xlane.xlu2 %390  ;;  %v449_v3 = vmul.f32 %v1818_v56, %v448_v58  ;;  %v490_v17 = vmul.f32 0.5, %v489_v60  ;;  %vm1891_vm11 = vmor %vm453_vm8, %vm454_vm9  ;;  %vm563_vm12 = vweird.f32 %v1815_v54  ;;  %vm484_vm3 = vweird.f32 %v1824_v59 }
  0xd5   : > { %v418_v4 = vmul.f32 %v1788_v23, %v391_v62  ;;  %v361_v5 = vpop.xlane.xlu1 %360  ;;  %v479_v29 = vmul.f32 %v1824_v59, %v478_v9  ;;  %v1908_v25 = vmul.f32 0.2, %v1873_v53  ;;  %vm613_vm13 = vcmp.gt.f32.partialorder %v1873_v53, 0.0 }
  0xd6   : > { %v408_v11 = vmul.f32 %v1788_v23, %v361_v5  ;;  %v358_v14 = vpop.xlane.xlu0 %357  ;;  %v450_v22 = vmul.f32 0.5, %v449_v3  ;;  %v491_v31 = vsub.f32 1.5, %v490_v17  ;;  %vm483_vm5 = vweird.f32 %v1802_v41 }
  0xd7   : > { %v1834_v10 = vadd.f32 1e-08, %v418_v4  ;;  %v1837_v15 = vpop.eup %1486  ;;  %v407_v28 = vmul.f32 %v1788_v23, %v358_v14  ;;  %v480_v48 = vmul.f32 0.5, %v479_v29 }
  0xd8   : > { %v1840_v18 = vpop.eup %1488  ;;  %v1844_v24 = vadd.f32 1e-08, %v408_v11  ;;  %v518_v33 = vmul.f32 %v1837_v15, %v1811_v52  ;;  %v451_v37 = vsub.f32 1.5, %v450_v22  ;;  %v492_v55 = vmul.f32 %v1809_v51, %v491_v31 }
  0xd9   : > { %1492 = vrsqrt.f32 %v1834_v10  ;;  %v558_v27 = vmul.f32 %v1840_v18, %v1815_v54  ;;  %v1861_v45 = vpop.eup %1490  ;;  %v1865_v46 = vadd.f32 1e-08, %v407_v28  ;;  %v481_v17 = vsub.f32 1.5, %v480_v48 }
  0xda   : > { %1494 = vrsqrt.f32 %v1844_v24  ;;  %v519_v36 = vmul.f32 %v1837_v15, %v518_v33  ;;  %v452_v62 = vmul.f32 %v1818_v56, %v451_v37  ;;  %v528_v5 = vmul.f32 %v1861_v45, %v1827_v61 }
  0xdb   : > { %v559_v39 = vmul.f32 %v1840_v18, %v558_v27  ;;  %1496 = vrsqrt.f32 %v1865_v46  ;;  %v496_v40 = vsel %vm1881_vm10, %v1809_v51, %v492_v55  ;;  %vm524_vm15 = vweird.f32 %v1837_v15 }
  0xdc   : > { %v370_v43 = vpop.xlane.xlu2 %369  ;;  %v520_v21 = vmul.f32 0.5, %v519_v36  ;;  %v456_v27 = vsel %vm1891_vm11, %v1818_v56, %v452_v62  ;;  %v529_v51 = vmul.f32 %v1861_v45, %v528_v5  ;;  %v1923_v37 = vmul.f32 %v496_v40, %v1717_v19 }
  0xdd   : > { %v411_v35 = vmul.f32 %v1788_v23, %v370_v43  ;;  %v382_v49 = vpop.xlane.xlu1 %381  ;;  %v560_v63 = vmul.f32 0.5, %v559_v39  ;;  %v1926_v56 = vmul.f32 %v1824_v59, %v481_v17  ;;  %vm573_vm1 = vweird.f32 %v1834_v10 }
  0xde   : > { %v373_v3 = vpop.xlane.xlu0 %372  ;;  %v415_v14 = vmul.f32 %v1788_v23, %v382_v49  ;;  %v1930_v48 = vmul.f32 %v456_v27, %v1720_v20  ;;  %vm564_vm2 = vweird.f32 %v1840_v18  ;;  %v530_v60 = vmul.f32 0.5, %v529_v51 }
  0xdf   : > { %v1867_v47 = vpop.eup %1492  ;;  %v1887_v16 = vadd.f32 1e-08, %v411_v35  ;;  %v561_v28 = vsub.f32 1.5, %v560_v63  ;;  %v412_v33 = vmul.f32 %v1788_v23, %v373_v3  ;;  %v521_v35 = vsub.f32 1.5, %v520_v21  ;;  %vm1955_vm7 = vmor %vm563_vm12, %vm564_vm2 }
  0xe0   : > { %v568_v57 = vmul.f32 %v1867_v47, %v1834_v10  ;;  %v1879_v58 = vpop.eup %1494  ;;  %v1917_v31 = vadd.f32 1e-08, %v415_v14  ;;  %vm473_vm4 = vweird.f32 %v1844_v24  ;;  %vm574_vm6 = vweird.f32 %v1867_v47 }
  0xe1   : > { %v468_v11 = vmul.f32 %v1879_v58, %v1844_v24  ;;  %1498 = vrsqrt.f32 %v1887_v16  ;;  %v1920_v34 = vpop.eup %1496  ;;  %v562_v19 = vmul.f32 %v1840_v18, %v561_v28  ;;  %vm463_vm8 = vweird.f32 %v1865_v46  ;;  %vm1973_vm10 = vmor %vm573_vm1, %vm574_vm6 }
  0xe2   : > { %v569_v9 = vmul.f32 %v1867_v47, %v568_v57  ;;  %v458_v49 = vmul.f32 %v1920_v34, %v1865_v46  ;;  %1500 = vrsqrt.f32 %v1917_v31  ;;  %v1940_v57 = vadd.f32 1e-08, %v412_v33  ;;  %vm2005_vm1 = vmor %vm523_vm14, %vm524_vm15 }
  0xe3   : > { %v469_v22 = vmul.f32 %v1879_v58, %v468_v11  ;;  %vm464_vm9 = vweird.f32 %v1920_v34  ;;  %v1962_v17 = vmul.f32 %v1837_v15, %v521_v35  ;;  %v566_v40 = vsel %vm1955_vm7, %v1840_v18, %v562_v19 }
  0xe4   : > { %v570_v29 = vmul.f32 0.5, %v569_v9  ;;  %v385_v43 = vpop.xlane.xlu2 %384  ;;  %v459_v20 = vmul.f32 %v1920_v34, %v458_v49  ;;  %1502 = vrsqrt.f32 %v1940_v57  ;;  %v630_v9 = vmul.f32 0.2, %v1930_v48  ;;  %vm1984_vm12 = vmor %vm463_vm8, %vm464_vm9 }
  0xe5   : > { %v470_v39 = vmul.f32 0.5, %v469_v22  ;;  %v416_v62 = vmul.f32 %v1788_v23, %v385_v43  ;;  %v397_v63 = vpop.xlane.xlu1 %396  ;;  %v531_v22 = vsub.f32 1.5, %v530_v60  ;;  %vm474_vm11 = vweird.f32 %v1879_v58 }
  0xe6   : > { %v571_v36 = vsub.f32 1.5, %v570_v29  ;;  %v394_v5 = vpop.xlane.xlu0 %393  ;;  %v460_v14 = vmul.f32 0.5, %v459_v20  ;;  %v420_v54 = vmul.f32 %v1788_v23, %v397_v63  ;;  %v1992_v43 = vmul.f32 %v566_v40, %v1702_v13  ;;  %vm2020_vm6 = vmor %vm473_vm4, %vm474_vm11 }
  0xe7   : > { %v1935_v55 = vpop.eup %1498  ;;  %v471_v3 = vsub.f32 1.5, %v470_v39  ;;  %v1977_v28 = vadd.f32 1e-08, %v416_v62  ;;  %v419_v29 = vmul.f32 %v1788_v23, %v394_v5  ;;  %vm614_vm2 = vcmp.gt.f32.partialorder %v1930_v48, 0.0 }
  0xe8   : > { %v498_v4 = vmul.f32 %v1935_v55, %v1887_v16  ;;  %v572_v21 = vmul.f32 %v1867_v47, %v571_v36  ;;  %v461_v27 = vsub.f32 1.5, %v460_v14  ;;  %v1980_v51 = vpop.eup %1500  ;;  %v1989_v39 = vadd.f32 1e-08, %v420_v54 }
  0xe9   : > { %v472_v18 = vmul.f32 %v1879_v58, %v471_v3  ;;  %v538_v49 = vmul.f32 %v1980_v51, %v1917_v31  ;;  %v1997_v19 = vadd.f32 1e-08, %v419_v29  ;;  %v645_v20 = vsel %vm613_vm13, %v1873_v53, %v1908_v25  ;;  %vm2040_vm13 = vmor %vm483_vm5, %vm484_vm3 }
  0xea   : > { %v499_v10 = vmul.f32 %v1935_v55, %v498_v4  ;;  %v462_v35 = vmul.f32 %v1920_v34, %v461_v27  ;;  %v1999_v36 = vpop.eup %1502  ;;  %v576_v13 = vsel %vm1973_vm10, %v1867_v47, %v572_v21  ;;  %1504 = vrsqrt.f32 %v1989_v39 }
  0xeb   : > { %v539_v47 = vmul.f32 %v1980_v51, %v538_v49  ;;  %v508_v63 = vmul.f32 %v1999_v36, %v1940_v57  ;;  %1506 = vrsqrt.f32 %v1977_v28  ;;  %v476_v53 = vsel %vm2020_vm6, %v1879_v58, %v472_v18 }
  0xec   : > { %v466_v62 = vsel %vm1984_vm12, %v1920_v34, %v462_v35  ;;  %v500_v25 = vmul.f32 0.5, %v499_v10  ;;  %1508 = vrsqrt.f32 %v1997_v19  ;;  %v646_v5 = vsel %vm614_vm2, %v1930_v48, %v630_v9  ;;  %v873_v21 = vpop.xlane.xlu2 %872 }
  0xed   : > { %v599_v24 = vmul.f32 %v466_v62, %v1661_v2  ;;  %v540_v3 = vmul.f32 0.5, %v539_v47  ;;  %v509_v4 = vmul.f32 %v1999_v36, %v508_v63  ;;  %v2046_v11 = vpack.c.bf16 %v645_v20, %v645_v20 }
  0xee   : > { %v486_v2 = vsel %vm2040_vm13, %v1824_v59, %v1926_v56  ;;  %v526_v41 = vsel %vm2005_vm1, %v1837_v15, %v1962_v17  ;;  %vm503_vm14 = vweird.f32 %v1887_v16  ;;  %v662_v58 = vpack.c.bf16 %v646_v5, %v646_v5 }
  0xef   : > { %v2058_v14 = vmul.f32 %v1861_v45, %v531_v22  ;;  %v2061_v48 = vmul.f32 %v576_v13, %v1737_v30  ;;  %v2064_v9 = vmul.f32 %v476_v53, %v1741_v32  ;;  %v541_v40 = vsub.f32 1.5, %v540_v3 }
  0xf0   : > { %v2066_v54 = vpop.eup %1504  ;;  %v943_v46 = vunpack.c.l.b16 %v2046_v11  ;;  %v944_v27 = vunpack.c.l.b16 %v662_v58  ;;  %vm615_vm15 = vcmp.gt.f32.partialorder %v599_v24, 0.0  ;;  %v631_v29 = vmul.f32 0.2, %v599_v24 }
  0xf1   : > { %v2069_v18 = vpop.eup %1506  ;;  %vm625_vm3 = vcmp.gt.f32.partialorder %v1992_v43, 0.0  ;;  %v501_v22 = vsub.f32 1.5, %v500_v25  ;;  %v510_v33 = vmul.f32 0.5, %v509_v4  ;;  %v588_v30 = vmul.f32 %v2066_v54, %v1989_v39 }
  0xf2   : > { %v2074_v32 = vpop.eup %1508  ;;  %v641_v10 = vmul.f32 0.2, %v1992_v43  ;;  %vm504_vm4 = vweird.f32 %v1935_v55  ;;  %vm543_vm5 = vweird.f32 %v1917_v31  ;;  %v951_v35 = vpack.c.b16 %v944_v27, %v943_v46 }
  0xf3   : > { %vm513_vm7 = vweird.f32 %v1940_v57  ;;  %v589_v49 = vmul.f32 %v2066_v54, %v588_v30  ;;  %v578_v13 = vmul.f32 %v2074_v32, %v1997_v19  ;;  %v647_v20 = vsel %vm615_vm15, %v599_v24, %v631_v29  ;;  %vm2095_vm9 = vmor %vm503_vm14, %vm504_vm4 }
  0xf4   : > { %v642_v52 = vmul.f32 0.2, %v2061_v48  ;;  %v632_v62 = vmul.f32 0.2, %v2064_v9  ;;  %v542_v47 = vmul.f32 %v1980_v51, %v541_v40  ;;  %vm544_vm8 = vweird.f32 %v1980_v51 }
  0xf5   : > { %v2088_v63 = vmul.f32 %v1935_v55, %v501_v22  ;;  %v511_v53 = vsub.f32 1.5, %v510_v33  ;;  %v579_v25 = vmul.f32 %v2074_v32, %v578_v13  ;;  %v958_v3 = vshll.u32 %v951_v35, 16  ;;  %vm2105_vm11 = vmor %vm543_vm5, %vm544_vm8 }
  0xf6   : > { %vm514_vm10 = vweird.f32 %v1999_v36  ;;  %v548_v4 = vmul.f32 %v2069_v18, %v1977_v28  ;;  %v663_v5 = vpack.c.bf16 %v647_v20, %v647_v20  ;;  %v877_v58 = vmul.f32 %v873_v21, %v1788_v23 }
  0xf7   : > { %v590_v46 = vmul.f32 0.5, %v589_v49  ;;  %v580_v16 = vmul.f32 0.5, %v579_v25  ;;  %v956_v27 = vshrl.u32 %v951_v35, 16  ;;  %v960_v29 = vrot.slane %v958_v3, 1  ;;  %v876_v49 = vpop.xlane.xlu0 %875  ;;  %vm2135_vm14 = vmor %vm513_vm7, %vm514_vm10 }
  0xf8   : > { %v546_v22 = vsel %vm2105_vm11, %v1980_v51, %v542_v47  ;;  %v2112_v33 = vunpack.c.l.b16 %v663_v5  ;;  %v2114_v30 = vadd.f32 1e-08, %v877_v58  ;;  %vm626_vm12 = vcmp.gt.f32.partialorder %v2061_v48, 0.0 }
  0xf9   : > { %v506_v31 = vsel %vm2095_vm9, %v1935_v55, %v2088_v63  ;;  %v512_v21 = vmul.f32 %v1999_v36, %v511_v53  ;;  %vm593_vm2 = vweird.f32 %v1989_v39  ;;  %vm583_vm6 = vweird.f32 %v1997_v19 }
  0xfa   : > { %v961_v35 = vor.u32 %v960_v29, %v956_v27  ;;  %v581_v13 = vsub.f32 1.5, %v580_v16  ;;  %v999_v20 = vpack.c.b16 %v2112_v33, %v2112_v33  ;;  %1510 = vrsqrt.f32 %v2114_v30 }
  0xfb   : > { %v657_v47 = vsel %vm625_vm3, %v1992_v43, %v641_v10  ;;  %v607_v63 = vmul.f32 %v546_v22, %v1655_v0  ;;  %v549_v25 = vmul.f32 %v2069_v18, %v548_v4  ;;  %v591_v3 = vsub.f32 1.5, %v590_v46 }
  0xfc   : > { %983 = vrot.lane.b32.xlu2 %v961_v35, %s1583_s13  ;;  %v658_v43 = vsel %vm626_vm12, %v2061_v48, %v642_v52  ;;  %vm584_vm15 = vweird.f32 %v2074_v32  ;;  %1003 = vrot.lane.b32.xlu1 %v999_v20, %s1584_s14  ;;  %v2146_v0 = vpack.c.bf16 %v657_v47, %v657_v47  ;;  %v878_v10 = vmul.f32 %v876_v49, %v1788_v23 }
  0xfd   : > { %v686_v55 = vpop.permute.xlu1 %685  ;;  %v674_v57 = vpack.c.bf16 %v658_v43, %v658_v43  ;;  %vm594_vm3 = vweird.f32 %v2066_v54  ;;  %vm616_vm4 = vcmp.gt.f32.partialorder %v2064_v9, 0.0  ;;  %v516_v48 = vsel %vm2135_vm14, %v1999_v36, %v512_v21  ;;  %vm2165_vm5 = vmor %vm583_vm6, %vm584_vm15 }
  0xfe   : > { %v709_v24 = vsel %vm348_vm0, %v686_v55, 0.0  ;;  %v582_v52 = vmul.f32 %v2074_v32, %v581_v13  ;;  %v2158_v5 = vunpack.c.l.b16 %v2146_v0  ;;  %v592_v40 = vmul.f32 %v2066_v54, %v591_v3  ;;  %vm2187_vm10 = vmor %vm593_vm2, %vm594_vm3 }
  0xff   : > { %v950_v58 = vunpack.c.l.b16 %v674_v57  ;;  %710 = vadd.xlane.f32.xlu0 %v709_v24  ;;  %v2169_v16 = vadd.f32 1e-08, %v878_v10  ;;  %v648_v36 = vsel %vm616_vm4, %v2064_v9, %v632_v62  ;;  %vm623_vm7 = vcmp.gt.f32.partialorder %v607_v63, 0.0 }
 0x100   : > { %v714_v51 = vpop.xlane.xlu2 %713  ;;  %v2174_v29 = vpop.eup %1510  ;;  %v664_v21 = vpack.c.bf16 %v648_v36, %v648_v36  ;;  %v639_v35 = vmul.f32 0.2, %v607_v63  ;;  %v603_v49 = vmul.f32 %v506_v31, %v1682_v8  ;;  %v604_v19 = vmul.f32 %v516_v48, %v1751_v38 }
 0x101   : > { %v734_v4 = vmul.f32 %v714_v51, %v1788_v23  ;;  %v954_v22 = vpack.c.b16 %v950_v58, %v2158_v5  ;;  %v550_v51 = vmul.f32 0.5, %v549_v25  ;;  %v882_v13 = vmul.f32 %v2174_v29, %v2114_v30 }
 0x102   : > { %vm533_vm8 = vweird.f32 %v1827_v61  ;;  %vm534_vm9 = vweird.f32 %v1861_v45  ;;  %v586_v8 = vsel %vm2165_vm5, %v2074_v32, %v582_v52  ;;  %v1035_v62 = vunpack.c.l.b16 %v664_v21 }
 0x103   : > { %v2172_v27 = vadd.f32 1e-08, %v734_v4  ;;  %v979_v38 = vshll.u32 %v954_v22, 16  ;;  %v596_v31 = vsel %vm2187_vm10, %v2066_v54, %v592_v40  ;;  %v977_v47 = vshrl.u32 %v954_v22, 16  ;;  %vm2232_vm3 = vmor %vm533_vm8, %vm534_vm9 }
 0x104   : > { %v655_v39 = vsel %vm623_vm7, %v607_v63, %v639_v35  ;;  %v883_v53 = vmul.f32 %v2174_v29, %v882_v13  ;;  %v1039_v3 = vpack.c.b16 %v1035_v62, %v2112_v33  ;;  %v551_v43 = vsub.f32 1.5, %v550_v51 }
 0x105   : > { %1512 = vrsqrt.f32 %v2172_v27  ;;  %v981_v25 = vrot.slane %v979_v38, 1  ;;  %vm553_vm11 = vweird.f32 %v1977_v28  ;;  %vm554_vm12 = vweird.f32 %v2069_v18 }
 0x106   : > { %1514 = vrsqrt.f32 %v2169_v16  ;;  %v611_v54 = vmul.f32 %v586_v8, %v1676_v6  ;;  %v635_v57 = vmul.f32 0.2, %v603_v49  ;;  %v1046_v24 = vshll.u32 %v1039_v3, 16  ;;  %vm2241_vm7 = vmor %vm553_vm11, %vm554_vm12 }
 0x107   : > { %v2206_v10 = vor.u32 %v981_v25, %v977_v47  ;;  %v671_v63 = vpack.c.bf16 %v655_v39, %v655_v39  ;;  %v636_v4 = vmul.f32 0.2, %v604_v19  ;;  %v612_v48 = vmul.f32 %v596_v31, %v1763_v44 }
 0x108   : > { %v726_v20 = vpop.xlane.xlu2 %725  ;;  %v720_v55 = vpop.xlane.xlu0 %719  ;;  %vm619_vm2 = vcmp.gt.f32.partialorder %v603_v49, 0.0  ;;  %v884_v58 = vmul.f32 0.5, %v883_v53  ;;  %v1044_v40 = vshrl.u32 %v1039_v3, 16  ;;  %v1048_v46 = vrot.slane %v1046_v24, 1 }
 0x109   : > { %v738_v32 = vmul.f32 %v726_v20, %v1788_v23  ;;  %989 = vrot.lane.b32.xlu2 %v2206_v10, %s1583_s13  ;;  %vm620_vm6 = vcmp.gt.f32.partialorder %v604_v19, 0.0  ;;  %v552_v36 = vmul.f32 %v2069_v18, %v551_v43  ;;  %v643_v22 = vmul.f32 0.2, %v611_v54 }
 0x10a   : > { %v736_v21 = vmul.f32 %v720_v55, %v1788_v23  ;;  %v1049_v44 = vor.u32 %v1048_v46, %v1044_v40  ;;  %v2222_v51 = vunpack.c.l.b16 %v671_v63  ;;  %v651_v13 = vsel %vm619_vm2, %v603_v49, %v635_v57 }
 0x10b   : > { %v2209_v52 = vadd.f32 1e-08, %v738_v32  ;;  %v2211_v33 = vpop.eup %1512  ;;  %v644_v20 = vmul.f32 0.2, %v612_v48  ;;  %vm887_vm14 = vweird.f32 %v2114_v30  ;;  %v652_v9 = vsel %vm620_vm6, %v604_v19, %v636_v4 }
 0x10c   : > { %v2215_v6 = vpop.eup %1514  ;;  %v760_v35 = vmul.f32 %v2211_v33, %v2172_v27  ;;  %v667_v8 = vpack.c.bf16 %v651_v13, %v651_v13  ;;  %v885_v38 = vsub.f32 1.5, %v884_v58  ;;  %1071 = vrot.lane.b32.xlu1 %v1049_v44, %s1585_s22  ;;  %v668_v31 = vpack.c.bf16 %v652_v9, %v652_v9 }
 0x10d   : > { %1516 = vrsqrt.f32 %v2209_v52  ;;  %v892_v62 = vmul.f32 %v2215_v6, %v2169_v16  ;;  %vm627_vm15 = vcmp.gt.f32.partialorder %v611_v54, 0.0  ;;  %vm888_vm4 = vweird.f32 %v2174_v29 }
 0x10e   : > { %v996_v19 = vunpack.c.l.b16 %v667_v8  ;;  %vm628_vm5 = vcmp.gt.f32.partialorder %v612_v48, 0.0  ;;  %v659_v47 = vsel %vm627_vm15, %v611_v54, %v643_v22  ;;  %v761_v61 = vmul.f32 %v2211_v33, %v760_v35  ;;  %vm2280_vm1 = vmor %vm887_vm14, %vm888_vm4 }
 0x10f   : > { %v1001_v53 = vpack.c.b16 %v2222_v51, %v2222_v51  ;;  %v2248_v25 = vadd.f32 1e-08, %v736_v21  ;;  %v1036_v3 = vunpack.c.l.b16 %v668_v31  ;;  %v2258_v28 = vmul.f32 %v526_v41, %v1679_v7 }
 0x110   : > { %v732_v39 = vpop.xlane.xlu0 %731  ;;  %v660_v43 = vsel %vm628_vm5, %v612_v48, %v644_v20  ;;  %v675_v54 = vpack.c.bf16 %v659_v47, %v659_v47  ;;  %v601_v57 = vmul.f32 %v486_v2, %v1658_v1  ;;  %v536_v24 = vsel %vm2232_vm3, %v1861_v45, %v2058_v14  ;;  %v717_v41 = vpop.xlane.xlu2 %716 }
 0x111   : > { %v886_v60 = vmul.f32 %v2174_v29, %v885_v38  ;;  %v893_v15 = vmul.f32 %v2215_v6, %v892_v62  ;;  %1007 = vrot.lane.b32.xlu2 %v1001_v53, %s1584_s14  ;;  %v556_v7 = vsel %vm2241_vm7, %v2069_v18, %v552_v36  ;;  %v1040_v45 = vpack.c.b16 %v1036_v3, %v996_v19 }
 0x112   : > { %v676_v56 = vpack.c.bf16 %v660_v43, %v660_v43  ;;  %v634_v17 = vmul.f32 0.2, %v1923_v37  ;;  %v762_v34 = vmul.f32 0.5, %v761_v61  ;;  %1518 = vrsqrt.f32 %v2248_v25 }
 0x113   : > { %v2250_v32 = vpop.eup %1516  ;;  %v2288_v2 = vunpack.c.l.b16 %v675_v54  ;;  %v2291_v14 = vmul.f32 0.2, %v2258_v28  ;;  %v2294_v18 = vmul.f32 %v536_v24, %v1730_v26  ;;  %v1051_v30 = vshrl.u32 %v1040_v45, 16 }
 0x114   : > { %v800_v59 = vmul.f32 %v2250_v32, %v2209_v52  ;;  %v1053_v63 = vshll.u32 %v1040_v45, 16  ;;  %v2297_v4 = vmul.f32 %v556_v7, %v1759_v42  ;;  %v890_v48 = vsel %vm2280_vm1, %v2174_v29, %v886_v60 }
 0x115   : > { %v894_v58 = vmul.f32 0.5, %v893_v15  ;;  %v1038_v40 = vunpack.c.l.b16 %v676_v56  ;;  %v740_v22 = vmul.f32 %v732_v39, %v1788_v23  ;;  %v735_v21 = vmul.f32 %v717_v41, %v1788_v23 }
 0x116   : > { %v801_v46 = vmul.f32 %v2250_v32, %v800_v59  ;;  %v1055_v36 = vrot.slane %v1053_v63, 1  ;;  %vm621_vm13 = vcmp.gt.f32.partialorder %v2258_v28, 0.0  ;;  %vm897_vm8 = vweird.f32 %v2169_v16 }
 0x117   : > { %v763_v26 = vsub.f32 1.5, %v762_v34  ;;  %v1042_v42 = vpack.c.b16 %v1038_v40, %v2288_v2  ;;  %v1000_v44 = vpack.c.b16 %v996_v19, %v996_v19  ;;  %v2308_v13 = vadd.f32 1e-08, %v735_v21 }
 0x118   : > { %v1056_v35 = vor.u32 %v1055_v36, %v1051_v30  ;;  %vm617_vm9 = vcmp.gt.f32.partialorder %v601_v57, 0.0  ;;  %v633_v29 = vmul.f32 0.2, %v601_v57  ;;  %v723_v20 = vpop.xlane.xlu0 %722  ;;  %v2310_v9 = vpop.eup %1518  ;;  %v901_v8 = vmul.f32 %v890_v48, %v1699_v12 }
 0x119   : > { %vm765_vm10 = vweird.f32 %v2172_v27  ;;  %vm766_vm11 = vweird.f32 %v2211_v33  ;;  %v1067_v38 = vshll.u32 %v1042_v42, 16  ;;  %1005 = vrot.lane.b32.xlu0 %v1000_v44, %s1584_s14  ;;  %v895_v62 = vsub.f32 1.5, %v894_v58 }
 0x11a   : > { %v802_v31 = vmul.f32 0.5, %v801_v46  ;;  %1073 = vrot.lane.b32.xlu2 %v1056_v35, %s1585_s22  ;;  %v2317_v49 = vadd.f32 1e-08, %v740_v22  ;;  %v649_v19 = vsel %vm617_vm9, %v601_v57, %v633_v29  ;;  %v1065_v47 = vshrl.u32 %v1042_v42, 16  ;;  %vm2331_vm2 = vmor %vm765_vm10, %vm766_vm11  ;;  %v1532_v46 = vld [vmem:[%s1652_s5 + $0x10] sm:$0xff] }
 0x11b   : > { %v1069_v39 = vrot.slane %v1067_v38, 1  ;;  %v2319_v55 = vpack.c.bf16 %v649_v19, %v649_v19  ;;  %v737_v12 = vmul.f32 %v723_v20, %v1788_v23  ;;  %v764_v61 = vmul.f32 %v2211_v33, %v763_v26 }
 0x11c   : > { %v780_v53 = vmul.f32 %v2310_v9, %v2248_v25  ;;  %1520 = vrsqrt.f32 %v2308_v13  ;;  %vm618_vm12 = vcmp.gt.f32.partialorder %v1923_v37, 0.0  ;;  %vm898_vm6 = vweird.f32 %v2215_v6 }
 0x11d   : > { %v1070_v43 = vor.u32 %v1069_v39, %v1065_v47  ;;  %v945_v54 = vunpack.c.l.b16 %v2319_v55  ;;  %v2336_v57 = vadd.f32 1e-08, %v737_v12  ;;  %v650_v24 = vsel %vm618_vm12, %v1923_v37, %v634_v17  ;;  %vm2353_vm15 = vmor %vm897_vm8, %vm898_vm6  ;;  %v917_v47 = vpop.xlane.xlu2 %916 }
 0x11e   : > { %1522 = vrsqrt.f32 %v2317_v49  ;;  %v666_v60 = vpack.c.bf16 %v650_v24, %v650_v24  ;;  %vm903_vm14 = vcmp.gt.f32.partialorder %v901_v8, 0.0  ;;  %v638_v15 = vmul.f32 0.2, %v2294_v18 }
 0x11f   : > { %v803_v27 = vsub.f32 1.5, %v802_v31  ;;  %1077 = vrot.lane.b32.xlu1 %v1070_v43, %s1585_s22  ;;  %1524 = vrsqrt.f32 %v2336_v57  ;;  %v905_v7 = vmul.f32 0.2, %v901_v8  ;;  %v896_v1 = vmul.f32 %v2215_v6, %v895_v62 }
 0x120   : > { %v768_v37 = vsel %vm2331_vm2, %v2211_v33, %v764_v61  ;;  %v1081_v59 = vpack.c.b16 %v945_v54, %v945_v54  ;;  %v946_v45 = vunpack.c.l.b16 %v666_v60  ;;  %v2349_v56 = vmul.f32 0.2, %v2297_v4 }
 0x121   : > { %v781_v34 = vmul.f32 %v2310_v9, %v780_v53  ;;  %v907_v41 = vsel %vm903_vm14, %v901_v8, %v905_v7  ;;  %vm622_vm3 = vcmp.gt.f32.partialorder %v2294_v18, 0.0  ;;  %vm806_vm4 = vweird.f32 %v2250_v32 }
 0x122   : > { %v2359_v30 = vpop.eup %1520  ;;  %1085 = vrot.lane.b32.xlu2 %v1081_v59, %s1586_s23  ;;  %v952_v33 = vpack.c.b16 %v946_v45, %v945_v54  ;;  %v909_v63 = vpack.c.bf16 %v907_v41, %v907_v41  ;;  %v653_v16 = vsel %vm621_vm13, %v2258_v28, %v2291_v14  ;;  %v804_v48 = vmul.f32 %v2250_v32, %v803_v27 }
 0x123   : > { %v654_v58 = vsel %vm622_vm3, %v2294_v18, %v638_v15  ;;  %v2369_v40 = vpack.c.bf16 %v653_v16, %v653_v16  ;;  %v830_v36 = vmul.f32 %v1532_v46, %v768_v37  ;;  %v900_v21 = vsel %vm2353_vm15, %v2215_v6, %v896_v1  ;;  %v1533_v15 = vld [vmem:[%s1652_s5 + $0x50] sm:$0xff] }
 0x124   : > { %v2372_v22 = vpop.eup %1522  ;;  %vm805_vm5 = vweird.f32 %v2209_v52  ;;  %v965_v26 = vshll.u32 %v952_v33, 16  ;;  %v2378_v42 = vunpack.c.l.b16 %v909_v63  ;;  %v2382_v14 = vmul.f32 0.5, %v781_v34 }
 0x125   : > { %v2380_v28 = vpop.eup %1524  ;;  %v770_v18 = vmul.f32 %v2359_v30, %v2308_v13  ;;  %v1083_v44 = vpack.c.b16 %v2158_v5, %v2158_v5  ;;  %v670_v35 = vpack.c.bf16 %v654_v58, %v654_v58  ;;  %vm2390_vm7 = vmor %vm805_vm5, %vm806_vm4  ;;  %v963_v29 = vshrl.u32 %v952_v33, 16 }
 0x126   : > { %v790_v52 = vmul.f32 %v2380_v28, %v2336_v57  ;;  %v967_v20 = vrot.slane %v965_v26, 1  ;;  %v2397_v8 = vunpack.c.l.b16 %v2369_v40  ;;  %v808_v5 = vsel %vm2390_vm7, %v2250_v32, %v804_v48 }
 0x127   : > { %v820_v62 = vmul.f32 %v2372_v22, %v2317_v49  ;;  %1089 = vrot.lane.b32.xlu1 %v1083_v44, %s1586_s23  ;;  %v1084_v31 = vpack.c.b16 %v2378_v42, %v2378_v42  ;;  %vm838_vm1 = vcmp.gt.f32.partialorder %v830_v36, 0.0  ;;  %v948_v12 = vunpack.c.l.b16 %v670_v35 }
 0x128   : > { %v729_v38 = vpop.xlane.xlu1 %728  ;;  %v791_v19 = vmul.f32 %v2380_v28, %v790_v52  ;;  %v968_v39 = vor.u32 %v967_v20, %v963_v29  ;;  %v846_v61 = vmul.f32 0.2, %v830_v36  ;;  %v902_v53 = vmul.f32 %v900_v21, %v1773_v50 }
 0x129   : > { %v783_v32 = vsub.f32 1.5, %v2382_v14  ;;  %v771_v3 = vmul.f32 %v2359_v30, %v770_v18  ;;  %v739_v43 = vmul.f32 %v729_v38, %v1788_v23  ;;  %v953_v24 = vpack.c.b16 %v948_v12, %v2397_v8  ;;  %v1534_v18 = vld [vmem:[%s1652_s5 + $0x40] sm:$0xff] }
 0x12a   : > { %v792_v54 = vmul.f32 0.5, %v791_v19  ;;  %985 = vrot.lane.b32.xlu0 %v968_v39, %s1583_s13  ;;  %1091 = vrot.lane.b32.xlu2 %v1084_v31, %s1586_s23  ;;  %v854_v60 = vsel %vm838_vm1, %v830_v36, %v846_v61  ;;  %v834_v27 = vmul.f32 %v1533_v15, %v808_v5  ;;  %vm785_vm13 = vweird.f32 %v2248_v25 }
 0x12b   : > { %v821_v50 = vmul.f32 %v2372_v22, %v820_v62  ;;  %v918_v7 = vmul.f32 %v917_v47, %v1788_v23  ;;  %v862_v1 = vpack.c.bf16 %v854_v60, %v854_v60  ;;  %v2419_v37 = vadd.f32 1e-08, %v739_v43 }
 0x12c   : > { %v793_v59 = vsub.f32 1.5, %v792_v54  ;;  %vm796_vm8 = vweird.f32 %v2380_v28  ;;  %v970_v45 = vshrl.u32 %v953_v24, 16  ;;  %v972_v17 = vshll.u32 %v953_v24, 16 }
 0x12d   : > { %v772_v34 = vmul.f32 0.5, %v771_v3  ;;  %vm795_vm9 = vweird.f32 %v2336_v57  ;;  %v1015_v41 = vunpack.c.l.b16 %v862_v1  ;;  %1526 = vrsqrt.f32 %v2419_v37 }
 0x12e   : > { %v794_v33 = vmul.f32 %v2380_v28, %v793_v59  ;;  %v974_v63 = vrot.slane %v972_v17, 1  ;;  %vm842_vm10 = vcmp.gt.f32.partialorder %v834_v27, 0.0  ;;  %v850_v16 = vmul.f32 0.2, %v834_v27  ;;  %vm797_vm11 = vmor %vm795_vm9, %vm796_vm8  ;;  %v1535_v59 = vld [vmem:[%s1652_s5 + $0x30] sm:$0xff] }
 0x12f   : > { %v906_v48 = vmul.f32 0.2, %v902_v53  ;;  %v2425_v58 = vadd.f32 1e-08, %v918_v7  ;;  %1123 = vrot.lane.b32.xlu1 %v968_v39, %s1587_s24  ;;  %v1019_v46 = vpack.c.b16 %v1015_v41, %v1015_v41  ;;  %vm624_vm12 = vcmp.gt.f32.partialorder %v2297_v4, 0.0 }
 0x130   : > { %v798_v57 = vsel %vm797_vm11, %v2380_v28, %v794_v33  ;;  %v2430_v36 = vor.u32 %v974_v63, %v970_v45  ;;  %v858_v21 = vsel %vm842_vm10, %v834_v27, %v850_v16  ;;  %v656_v26 = vsel %vm624_vm12, %v2297_v4, %v2349_v56 }
 0x131   : > { %v773_v14 = vsub.f32 1.5, %v772_v34  ;;  %v833_v44 = vmul.f32 %v1534_v18, %v798_v57  ;;  %v866_v35 = vpack.c.bf16 %v858_v21, %v858_v21  ;;  %v672_v6 = vpack.c.bf16 %v656_v26, %v656_v26 }
 0x132   : > { %v784_v52 = vmul.f32 %v2310_v9, %v783_v32  ;;  %vm786_vm2 = vweird.f32 %v2310_v9  ;;  %v822_v29 = vmul.f32 0.5, %v821_v50  ;;  %987 = vrot.lane.b32.xlu0 %v2430_v36, %s1583_s13  ;;  %1023 = vrot.lane.b32.xlu2 %v1019_v46, %s1584_s14  ;;  %vm904_vm6 = vcmp.gt.f32.partialorder %v902_v53, 0.0 }
 0x133   : > { %v1527_v28 = vpop.eup %1526  ;;  %1528 = vrsqrt.f32 %v2425_v58  ;;  %v1037_v4 = vunpack.c.l.b16 %v672_v6  ;;  %vm841_vm14 = vcmp.gt.f32.partialorder %v833_v44, 0.0  ;;  %v849_v56 = vmul.f32 0.2, %v833_v44  ;;  %vm2449_vm3 = vmor %vm785_vm13, %vm786_vm2 }
 0x134   : > { %vm776_vm15 = vweird.f32 %v2359_v30  ;;  %v810_v20 = vmul.f32 %v1527_v28, %v2419_v37  ;;  %v1017_v38 = vunpack.c.l.b16 %v866_v35  ;;  %v908_v5 = vsel %vm904_vm6, %v902_v53, %v906_v48  ;;  %v1537_v48 = vld [vmem:[%s1652_s5 + $0x60] sm:$0xff] }
 0x135   : > { %v774_v62 = vmul.f32 %v2359_v30, %v773_v14  ;;  %v1041_v31 = vpack.c.b16 %v1037_v4, %v2222_v51  ;;  %v857_v19 = vsel %vm841_vm14, %v833_v44, %v849_v56  ;;  %v910_v47 = vpack.c.bf16 %v908_v5, %v908_v5 }
 0x136   : > { %v811_v12 = vmul.f32 %v1527_v28, %v810_v20  ;;  %v2453_v61 = vpack.c.bf16 %v857_v19, %v857_v19  ;;  %vm775_vm4 = vweird.f32 %v2308_v13  ;;  %v1002_v53 = vpack.c.b16 %v2288_v2, %v2288_v2 }
 0x137   : > { %v1114_v32 = vunpack.c.l.b16 %v910_v47  ;;  %vm2458_vm5 = vmor %vm775_vm4, %vm776_vm15  ;;  %v1021_v43 = vpack.c.b16 %v1017_v38, %v1017_v38  ;;  %v1060_v25 = vshll.u32 %v1041_v31, 16  ;;  %v788_v13 = vsel %vm2449_vm3, %v2310_v9, %v784_v52 }
 0x138   : > { %v812_v3 = vmul.f32 0.5, %v811_v12  ;;  %v1098_v54 = vunpack.c.l.b16 %v2453_v61  ;;  %v823_v60 = vsub.f32 1.5, %v822_v29  ;;  %v778_v2 = vsel %vm2458_vm5, %v2359_v30, %v774_v62  ;;  %v1538_v29 = vld [vmem:[%s1652_s5 + $0x70] sm:$0xff] }
 0x139   : > { %v2463_v24 = vpop.eup %1528  ;;  %v1115_v15 = vpack.c.b16 %v1114_v32, %v2378_v42  ;;  %vm815_vm7 = vweird.f32 %v2419_v37  ;;  %vm816_vm1 = vweird.f32 %v1527_v28  ;;  %v1062_v9 = vrot.slane %v1060_v25, 1  ;;  %v1536_v42 = vld [vmem:[%s1652_s5 + $0x20] sm:$0xff] }
 0x13a   : > { %v813_v27 = vsub.f32 1.5, %v812_v3  ;;  %1009 = vrot.lane.b32.xlu0 %v1002_v53, %s1584_s14  ;;  %1027 = vrot.lane.b32.xlu2 %v1021_v43, %s1584_s14  ;;  %v1102_v50 = vpack.c.b16 %v1098_v54, %v1098_v54  ;;  %v832_v30 = vmul.f32 %v1535_v59, %v788_v13  ;;  %v824_v45 = vmul.f32 %v2372_v22, %v823_v60  ;;  %vm817_vm8 = vmor %vm815_vm7, %vm816_vm1  ;;  %v1539_v43 = vld [vmem:[%s1693_s12] sm:$0xff] }
 0x13b   : > { %v1119_v7 = vshll.u32 %v1115_v15, 16  ;;  %vm826_vm13 = vweird.f32 %v2372_v22  ;;  %v831_v17 = vmul.f32 %v1536_v42, %v778_v2  ;;  %v921_v34 = vmul.f32 %v2463_v24, %v2425_v58 }
 0x13c   : > { %v814_v1 = vmul.f32 %v1527_v28, %v813_v27  ;;  %1107 = vrot.lane.b32.xlu1 %v1102_v50, %s1586_s23  ;;  %v1058_v33 = vshrl.u32 %v1041_v31, 16  ;;  %v1117_v63 = vshrl.u32 %v1115_v15, 16  ;;  %vm825_vm9 = vweird.f32 %v2317_v49 }
 0x13d   : > { %v1121_v16 = vrot.slane %v1119_v7, 1  ;;  %vm2487_vm10 = vmor %vm825_vm9, %vm826_vm13  ;;  %v848_v26 = vmul.f32 0.2, %v832_v30  ;;  %v847_v18 = vmul.f32 0.2, %v831_v17  ;;  %v922_v44 = vmul.f32 %v2463_v24, %v921_v34 }
 0x13e   : > { %v818_v41 = vsel %vm817_vm8, %v1527_v28, %v814_v1  ;;  %v1063_v21 = vor.u32 %v1062_v9, %v1058_v33  ;;  %v828_v37 = vsel %vm2487_vm10, %v2372_v22, %v824_v45  ;;  %vm840_vm12 = vcmp.gt.f32.partialorder %v832_v30, 0.0 }
 0x13f   : > { %v835_v46 = vmul.f32 %v1537_v48, %v818_v41  ;;  %v1122_v49 = vor.u32 %v1121_v16, %v1117_v63  ;;  %vm839_vm2 = vcmp.gt.f32.partialorder %v831_v17, 0.0  ;;  %v856_v52 = vsel %vm840_vm12, %v832_v30, %v848_v26  ;;  %v1210_v26 = vld [vmem:[%s2608_s2 + $0x10] sm:$0x3] }
 0x140   : > { %v836_v28 = vmul.f32 %v1538_v29, %v828_v37  ;;  %v855_v4 = vsel %vm839_vm2, %v831_v17, %v847_v18  ;;  %v923_v56 = vmul.f32 0.5, %v922_v44  ;;  %v1082_v20 = vpack.c.b16 %v2397_v8, %v2397_v8  ;;  %v1540_v29 = vld [vmem:[%s1652_s5] sm:$0xff]  ;;  %s1401_s5 = sshll.u32 %s1563_s15, 2 }
 0x141   : > { %vm843_vm11 = vcmp.gt.f32.partialorder %v835_v46, 0.0  ;;  %v851_v14 = vmul.f32 0.2, %v835_v46  ;;  %v864_v38 = vpack.c.bf16 %v856_v52, %v856_v52  ;;  %v863_v62 = vpack.c.bf16 %v855_v4, %v855_v4  ;;  %v1423_v52 = vld [vmem:[%s2608_s2 + $0x8] sm:$0xff]  ;;  %p306_p8 = scmp.lt.s32.totalorder %s1401_s5, 7 }
 0x142   : > { %1075 = vrot.lane.b32.xlu0 %v1063_v21, %s1585_s22  ;;  %v852_v31 = vmul.f32 0.2, %v836_v28  ;;  %v924_v19 = vsub.f32 1.5, %v923_v56  ;;  %vm844_vm6 = vcmp.gt.f32.partialorder %v836_v28, 0.0  ;;  %vm927_vm14 = vweird.f32 %v2463_v24  ;;  %v1422_v56 = vld [vmem:[%s2608_s2] sm:$0xff] }
 0x143   : > { %v859_v35 = vsel %vm843_vm11, %v835_v46, %v851_v14  ;;  %v1016_v47 = vunpack.c.l.b16 %v864_v38  ;;  %v2504_v39 = vsel %vm348_vm0, %v2319_v55, %v863_v62  ;;  %vm926_vm15 = vweird.f32 %v2425_v58  ;;  %s2672_s5 = smov (!%p306_p8, %s1401_s5), 7 }
 0x144   : > { %1129 = vrot.lane.b32.xlu1 %v1122_v49, %s1587_s24  ;;  %v867_v6 = vpack.c.bf16 %v859_v35, %v859_v35  ;;  %v860_v12 = vsel %vm844_vm6, %v836_v28, %v852_v31  ;;  %v925_v53 = vmul.f32 %v2463_v24, %v924_v19  ;;  %vm928_vm3 = vmor %vm926_vm15, %vm927_vm14  ;;  %v1139_v55 = vsel %vm348_vm0, %v2369_v40, %v2453_v61  ;;  %s309_s7 = sadd.s32 %s1402_s6, %s2672_s5 }
 0x145   : > { %v1020_v8 = vpack.c.b16 %v1016_v47, %v1016_v47  ;;  %v868_v32 = vpack.c.bf16 %v860_v12, %v860_v12  ;;  %vm1143_vm5 = vcmask 64512   ;;  %vm1152_vm7 = vcmask 97280   ;;  %s1403_s8 = sshll.u32 %s309_s7, 3 }
 0x146   : > { %v1099_v22 = vunpack.c.l.b16 %v867_v6  ;;  %v929_v51 = vsel %vm928_vm3, %v2463_v24, %v925_v53  ;;  %v1097_v24 = vunpack.c.l.b16 %v863_v62  ;;  %v1234_v14 = vunpack.c.l.b16 %v1210_v26  ;;  %s311_s13 = scalar_lea.vmem %s2610_s4, %s1403_s8 }
 0x147   : > { %v1018_v3 = vunpack.c.l.b16 %v868_v32  ;;  %v930_v25 = vmul.f32 %v1539_v43, %v929_v51  ;;  %vm1247_vm13 = vcmask 1041408   ;;  %vm1161_vm11 = vcmask 130048  }
 0x148   : > { %v1103_v5 = vpack.c.b16 %v1099_v22, %v1099_v22  ;;  %v1101_v2 = vpack.c.b16 %v1097_v24, %v1097_v24  ;;  %v1237_v18 = vpack.c.b16 %v1234_v14, %v1234_v14  ;;  %vm1170_vm12 = vcmask 162816  }
 0x149   : > { %v1022_v54 = vpack.c.b16 %v1018_v3, %v1018_v3  ;;  %v932_v13 = vmul.f32 0.2, %v930_v25  ;;  %vm931_vm4 = vcmp.gt.f32.partialorder %v930_v25, 0.0  ;;  %vm1179_vm2 = vcmask 195584  }
 0x14a   : > { %1087 = vrot.lane.b32.xlu0 %v1082_v20, %s1586_s23  ;;  %1109 = vrot.lane.b32.xlu2 %v1103_v5, %s1586_s23  ;;  %v1249_v49 = vsel %vm1247_vm13, %v1237_v18, 0  ;;  %vm1197_vm6 = vcmask 261120   ;;  %vm1240_vm14 = vcmask 293888  }
 0x14b   : > { %v933_v60 = vsel %vm931_vm4, %v930_v25, %v932_v13  ;;  %1256 = vmatpush.bf16.msra.mxu0 %v1249_v49  ;;  %1424 = vmatpush.bf16.msra.mxu1 %v1249_v49 }
 0x14c   : > { %v934_v15 = vpack.c.bf16 %v933_v60, %v933_v60 }
 0x14e   : > { %v1100_v27 = vunpack.c.l.b16 %v934_v15 }
 0x14f   : > { %1257 = vmatpush.bf16.msra.mxu0 %v1423_v52  ;;  %1425 = vmatpush.bf16.msra.mxu1 %v1423_v52 }
 0x150   : > { %v1104_v50 = vpack.c.b16 %v1100_v27, %v1100_v27 }
 0x152   : > { %1025 = vrot.lane.b32.xlu0 %v1020_v8, %s1584_s14  ;;  %1125 = vrot.lane.b32.xlu2 %v2430_v36, %s1587_s24  ;;  %v1142_v36 = vsel %vm348_vm0, %v2146_v0, %v867_v6 }
 0x153   : > { %1258 = vmatpush.bf16.msra.mxu0 %v1422_v56  ;;  %1426 = vmatpush.bf16.msra.mxu1 %v1422_v56 }
 0x156   : > { %v2518_v58 = vpop.permute.xlu2 %983 }
 0x15a   : > { %1029 = vrot.lane.b32.xlu0 %v1022_v54, %s1584_s14 }
 0x162   : > { %1105 = vrot.lane.b32.xlu0 %v1101_v2, %s1586_s23 }
 0x163   : > { %v990_v40 = vpop.permute.xlu2 %989 }
 0x164   : > { %v2524_v61 = vsel %vm1143_vm5, %v1142_v36, %v990_v40 }
 0x16a   : > { %1111 = vrot.lane.b32.xlu0 %v1104_v50, %s1586_s23 }
 0x16b   : > { %v1008_v9 = vpop.permute.xlu2 %1007 }
 0x16e   : > { %v1004_v34 = vpop.permute.xlu1 %1003 }
 0x172   : > { %1127 = vrot.lane.b32.xlu0 %v2206_v10, %s1587_s24  ;;  %v711_v7 = vpop.xlane.xlu0 %710 }
 0x173   : > { %v733_v1 = vmul.f32 %v711_v7, %v1788_v23 }
 0x174   : > { %v1074_v45 = vpop.permute.xlu2 %1073 }
 0x175   : > { %v741_v59 = vadd.f32 1e-08, %v733_v1 }
 0x177   : > { %1530 = vrsqrt.f32 %v741_v59  ;;  %vm755_vm8 = vweird.f32 %v741_v59 }
 0x17c   : > { %v2530_v41 = vpop.permute.xlu2 %1085 }
 0x17d   : > { %v1531_v0 = vpop.eup %1530 }
 0x17e   : > { %v750_v17 = vmul.f32 %v1531_v0, %v741_v59  ;;  %v1072_v46 = vpop.permute.xlu1 %1071  ;;  %vm756_vm1 = vweird.f32 %v1531_v0 }
 0x17f   : > { %vm757_vm9 = vmor %vm755_vm8, %vm756_vm1 }
 0x180   : > { %v751_v33 = vmul.f32 %v1531_v0, %v750_v17 }
 0x182   : > { %v752_v23 = vmul.f32 0.5, %v751_v33 }
 0x184   : > { %v753_v48 = vsub.f32 1.5, %v752_v23  ;;  %v2536_v21 = vpop.permute.xlu2 %1091 }
 0x186   : > { %v754_v37 = vmul.f32 %v1531_v0, %v753_v48 }
 0x188   : > { %v758_v44 = vsel %vm757_vm9, %v1531_v0, %v754_v37 }
 0x189   : > { %v829_v28 = vmul.f32 %v1540_v29, %v758_v44 }
 0x18b   : > { %v1006_v30 = vpop.permute.xlu0 %1005  ;;  %v845_v22 = vmul.f32 0.2, %v829_v28  ;;  %vm837_vm10 = vcmp.gt.f32.partialorder %v829_v28, 0.0 }
 0x18c   : > { %v1024_v4 = vpop.permute.xlu2 %1023 }
 0x18d   : > { %v853_v38 = vsel %vm837_vm10, %v829_v28, %v845_v22 }
 0x18e   : > { %v861_v62 = vpack.c.bf16 %v853_v38, %v853_v38 }
 0x190   : > { %v1133_v12 = vsel %vm348_vm0, %v2046_v11, %v861_v62  ;;  %vm1188_vm0 = vcmask 228352  }
 0x191   : > { %v1078_v35 = vpop.permute.xlu1 %1077  ;;  %v1145_v8 = vsel %vm1143_vm5, %v1133_v12, %v2518_v58 }
 0x194   : > { %v1028_v31 = vpop.permute.xlu2 %1027 }
 0x199   : > { %v1090_v5 = vpop.permute.xlu1 %1089 }
 0x19c   : > { %v986_v42 = vpop.permute.xlu0 %985 }
 0x19d   : > { %v1147_v19 = vsel %vm1143_vm5, %v2504_v39, %v986_v42 }
 0x19e   : > { %v1156_v53 = vsel %vm1152_vm7, %v1147_v19, %v1006_v30 }
 0x1a1   : > { %v1124_v32 = vpop.permute.xlu1 %1123 }
 0x1a4   : > { %v988_v63 = vpop.permute.xlu0 %987  ;;  %v1110_v3 = vpop.permute.xlu2 %1109 }
 0x1a5   : > { %v1149_v16 = vsel %vm1143_vm5, %v1139_v55, %v988_v63  ;;  %v1154_v55 = vsel %vm1152_vm7, %v1145_v8, %v1004_v34 }
 0x1a6   : > { %v2534_v10 = vsel %vm1152_vm7, %v1149_v16, %v1008_v9  ;;  %v1163_v25 = vsel %vm1161_vm11, %v1154_v55, %v1024_v4 }
 0x1a7   : > { %v1172_v13 = vsel %vm1170_vm12, %v1163_v25, %v1072_v46  ;;  %v1475_v46 = vld [vmem:[%s2609_s3] ss:$0 sm:$0xff] }
 0x1a8   : > { %v1181_v2 = vsel %vm1179_vm2, %v1172_v13, %v2530_v41 }
 0x1ac   : > { %v1010_v57 = vpop.permute.xlu0 %1009  ;;  %v1126_v24 = vpop.permute.xlu2 %1125 }
 0x1ad   : > { %v1160_v7 = vsel %vm1152_vm7, %v2524_v61, %v1010_v57 }
 0x1ae   : > { %v1108_v54 = vpop.permute.xlu1 %1107 }
 0x1b4   : > { %v1076_v6 = vpop.permute.xlu0 %1075 }
 0x1b6   : > { %v1130_v34 = vpop.permute.xlu1 %1129 }
 0x1bc   : > { %v1088_v20 = vpop.permute.xlu0 %1087 }
 0x1c4   : > { %v1026_v47 = vpop.permute.xlu0 %1025 }
 0x1c5   : > { %v1165_v51 = vsel %vm1161_vm11, %v1156_v53, %v1026_v47 }
 0x1c6   : > { %v1174_v43 = vsel %vm1170_vm12, %v1165_v51, %v1074_v45  ;;  %v1167_v45 = vsel %vm1161_vm11, %v2534_v10, %v1028_v31 }
 0x1c7   : > { %v1183_v11 = vsel %vm1179_vm2, %v1174_v43, %v1088_v20  ;;  %v1176_v0 = vsel %vm1170_vm12, %v1167_v45, %v1076_v6 }
 0x1c8   : > { %v1192_v58 = vsel %vm1188_vm0, %v1183_v11, %v1108_v54  ;;  %v1185_v17 = vsel %vm1179_vm2, %v1176_v0, %v1090_v5 }
 0x1c9   : > { %v1201_v15 = vsel %vm1197_vm6, %v1192_v58, %v1126_v24  ;;  %v1194_v63 = vsel %vm1188_vm0, %v1185_v17, %v1110_v3 }
 0x1ca   : > { %v1220_v50 = vunpack.c.l.b16 %v1201_v15 }
 0x1cc   : > { %v1030_v39 = vpop.permute.xlu0 %1029 }
 0x1cd   : > { %v1169_v1 = vsel %vm1161_vm11, %v1160_v7, %v1030_v39 }
 0x1ce   : > { %v1178_v59 = vsel %vm1170_vm12, %v1169_v1, %v1078_v35 }
 0x1cf   : > { %v1187_v42 = vsel %vm1179_vm2, %v1178_v59, %v2536_v21 }
 0x1d4   : > { %v1106_v60 = vpop.permute.xlu0 %1105 }
 0x1d5   : > { %v1190_v36 = vsel %vm1188_vm0, %v1181_v2, %v1106_v60 }
 0x1d6   : > { %v1199_v40 = vsel %vm1197_vm6, %v1190_v36, %v1124_v32 }
 0x1d7   : > { %v1219_v27 = vunpack.c.l.b16 %v1199_v40 }
 0x1d9   : > { %v1223_v9 = vpack.c.b16 %v1220_v50, %v1219_v27 }
 0x1db   : > { %1412 = vmatmul.msk.bf16.vlgmr.msra.gmra.mxu0 %vm1240_vm14, %v1223_v9 }
 0x1dc   : > { %v1112_v30 = vpop.permute.xlu0 %1111 }
 0x1dd   : > { %v1196_v61 = vsel %vm1188_vm0, %v1187_v42, %v1112_v30 }
 0x1de   : > { %v1205_v41 = vsel %vm1197_vm6, %v1196_v61, %v1130_v34 }
 0x1df   : > { %v1222_v23 = vunpack.c.l.b16 %v1205_v41 }
 0x1e4   : > { %v1128_v33 = vpop.permute.xlu0 %1127 }
 0x1e5   : > { %v1203_v16 = vsel %vm1197_vm6, %v1194_v63, %v1128_v33 }
 0x1e6   : > { %v1221_v10 = vunpack.c.l.b16 %v1203_v16 }
 0x1e8   : > { %v1224_v48 = vpack.c.b16 %v1222_v23, %v1221_v10 }
 0x1ea   : > { %1413 = vmatmul.msk.bf16.vlgmr.msra.gmra.mxu1 %vm1240_vm14, %v1224_v48 }
 0x258   : > { %v1260_v57 = vpop.f32.mrf.mxu0 }
 0x259   : > { %v1261_v21 = vadd.f32 %v1475_v46, %v1260_v57 }
 0x25b   : > { %1270 = vst [vmem:[%s311_s13] sm:$0xff] %v1261_v21 }
 0x260   : > { %v1262_v26 = vpop.f32.mrf.mxu0 }
 0x261   : > { %v1263_v37 = vadd.f32 %v1475_v46, %v1262_v26 }
 0x263   : > { %1271 = vst [vmem:[%s311_s13 + $0x8] sm:$0xff] %v1263_v37 }
 0x267   : > { %v1265_v14 = vpop.f32.mrf.mxu1 }
 0x268   : > { %v1266_v18 = vadd.f32 %v1475_v46, %v1265_v14 }
 0x26a   : > { %1272 = vst [vmem:[%s311_s13 + $0x10] sm:$0xff] %v1266_v18 }
 0x26f   : > { %v1267_v44 = vpop.f32.mrf.mxu1 }
 0x270   : > { %v1268_v49 = vadd.f32 %v1475_v46, %v1267_v44 }
 0x272   : > { %1273 = vst [vmem:[%s311_s13 + $0x18] sm:$0xff] %v1268_v49 }
 0x273 PF: > { %s14_s19 = sadd.s32 1, %s1579_s19   ;;  %s2657_s15 = smov %s1571_s17 }
 0x274   : > { %p11_p9 = scmp.ge.s32.totalorder %s14_s19, 6   ;;  %s2658_s16 = smov %s1575_s18 }
 0x275   : > { %s2659_s17 = smov %s2662_s20  ;;  %s2660_s18 = smov %s2666_s21 }
 0x276   :  { %13 = sbr.rel (!%p11_p9) target bundleno = 3 (0x3), region = 69 }

</bundles_post_ra>
